<compile_context>
chip_gen: v7x
topology: tpu7x:2x2x1
jax: 0.10.0
libtpu: 0.0.40
codegen_flags: <defaults>
</compile_context>

<pallas_src>
import functools

import jax
import jax.numpy as jnp
from jax.experimental import pallas as pl
from jax.experimental.pallas import tpu as pltpu

KW = 4            # kernel size
PADW = 1          # padding
BN_EPS = 1e-5
LRELU_SLOPE = 0.2
LANE = 128        # TPU lane width -> Cout padding / min tile
SUBLANE_PACK = 16 # bf16 sublane packing -> row-tile granularity


def _round_up(x, m):
    return (x + m - 1) // m * m


@functools.lru_cache(maxsize=None)
def _mxu_wide():
    """True on chips with 256-wide MXUs (v6e / v7x); False on v5e and older / unknown."""
    try:
        kind = jax.devices()[0].device_kind.lower()
    except Exception:
        return False
    return ("v6" in kind) or ("v7" in kind)


def _choose_tn(cout_pad):
    if cout_pad % 256 == 0 and _mxu_wide():
        return 256
    return LANE


def _choose_tm(m_real, K, tn):
    """Row-tile size: full (rounded) M for small layers, else ~512 rows bounded by VMEM."""
    if m_real <= 512:
        return _round_up(max(m_real, 8), SUBLANE_PACK)
    tm = 512
    # Keep (double-buffered) patches + weights + f32 out tile comfortably under v7x's 64 MiB VMEM.
    while tm > 64 and (2 * tm * K * 2 + 2 * K * tn * 2 + 2 * tm * tn * 4) > 40 * 1024 * 1024:
        tm //= 2
    return tm


def _vmem_limit(blocks, headroom=4 * 1024 * 1024):
    """blocks: list of (bytes_per_block, buffer_count). Returns a clamped vmem_limit_bytes."""
    total = sum(int(b) * int(n) for b, n in blocks) + headroom
    return int(min(max(total, 16 * 1024 * 1024), 64 * 1024 * 1024))


# ----------------------------- Pallas kernels --------------------------------
def _gemm_stats_kernel(p_ref, w_ref, y_ref, st_ref, *, tm, m_real):
    """Pass 1 (BN layers): GEMM tile + per-tile partial BN stats.

    p_ref:[tm,K] bf16, w_ref:[K,tn] bf16, y_ref:[tm,tn] f32 (raw conv out),
    st_ref:[1,2,tn] f32 -> row0 = masked sum, row1 = masked sum of squared deviations
    about the tile mean (pad rows >= m_real are exact GEMM zeros and are masked out).
    """
    acc = jnp.dot(p_ref[...], w_ref[...], preferred_element_type=jnp.float32)
    y_ref[...] = acc

    mi = pl.program_id(1)
    if m_real % tm == 0:  # static: no padded rows -> skip masking entirely
        s1 = jnp.sum(acc, axis=0, keepdims=True)                       # [1, tn]
        mean_t = s1 * (1.0 / float(tm))
        dev = acc - mean_t
    else:
        rows = mi * tm + jax.lax.broadcasted_iota(jnp.int32, acc.shape, 0)
        valid = rows < m_real
        acc_m = jnp.where(valid, acc, 0.0)
        cnt = jnp.minimum(float(tm), float(m_real) - mi.astype(jnp.float32) * float(tm))
        s1 = jnp.sum(acc_m, axis=0, keepdims=True)                     # [1, tn]
        mean_t = s1 / cnt
        dev = jnp.where(valid, acc - mean_t, 0.0)
    ssd = jnp.sum(dev * dev, axis=0, keepdims=True)                    # [1, tn]
    st_ref[...] = jnp.concatenate([s1, ssd], axis=0)[None, :, :]       # [1, 2, tn]


def _bn_act_kernel(y_ref, sc_ref, sh_ref, o_ref, *, use_lrelu):
    """Pass 2 (BN layers): y*scale + shift (+ LeakyReLU), store bf16/f32."""
    y = y_ref[...] * sc_ref[...] + sh_ref[...]
    if use_lrelu:
        y = jnp.where(y > 0, y, LRELU_SLOPE * y)
    o_ref[...] = y.astype(o_ref.dtype)


def _gemm_bias_act_kernel(*refs, use_bias, use_lrelu):
    """Single-pass kernel (non-BN layers): GEMM + bias (+ LeakyReLU)."""
    it = iter(refs)
    p_ref = next(it)
    w_ref = next(it)
    b_ref = next(it) if use_bias else None
    o_ref = next(it)
    acc = jnp.dot(p_ref[...], w_ref[...], preferred_element_type=jnp.float32)
    if use_bias:
        acc = acc + b_ref[...]
    if use_lrelu:
        acc = jnp.where(acc > 0, acc, LRELU_SLOPE * acc)
    o_ref[...] = acc.astype(o_ref.dtype)


# ----------------------------- pallas_call wrappers ---------------------------
def _gemm_stats(patches, w_mat, *, tm, tn, m_real):
    Mp, K = patches.shape
    Cp = w_mat.shape[1]
    gm, gn = Mp // tm, Cp // tn
    kern = functools.partial(_gemm_stats_kernel, tm=tm, m_real=m_real)
    vmem = _vmem_limit([(tm * K * 2, 2), (K * tn * 2, 2), (tm * tn * 4, 2), (2 * tn * 4, 2)])
    return pl.pallas_call(
        kern,
        out_shape=(jax.ShapeDtypeStruct((Mp, Cp), jnp.float32),
                   jax.ShapeDtypeStruct((gm, 2, Cp), jnp.float32)),
        grid=(gn, gm),  # m fastest -> weight block stays resident across the inner m sweep
        in_specs=[pl.BlockSpec((tm, K), lambda n, m: (m, 0)),
                  pl.BlockSpec((K, tn), lambda n, m: (0, n))],
        out_specs=(pl.BlockSpec((tm, tn), lambda n, m: (m, n)),
                   pl.BlockSpec((1, 2, tn), lambda n, m: (m, 0, n))),
        compiler_params=pltpu.CompilerParams(
            dimension_semantics=("parallel", "parallel"),
            vmem_limit_bytes=vmem),
    )(patches, w_mat)


def _combine_bn_stats(stats, gamma, beta, m_real, tm):
    """Tiny per-channel combine (Chan's parallel variance) in plain JAX."""
    gm = stats.shape[0]
    cnt = jnp.minimum(tm, m_real - tm * jnp.arange(gm)).astype(jnp.float32)[:, None]  # [gm, 1]
    s1 = stats[:, 0, :]
    ssd = stats[:, 1, :]
    gmean = jnp.sum(s1, axis=0) / float(m_real)                                       # [Cp]
    mean_t = s1 / cnt
    gssd = jnp.sum(ssd, axis=0) + jnp.sum(cnt * jnp.square(mean_t - gmean[None, :]), axis=0)
    var = jnp.maximum(gssd / float(m_real), 0.0)
    scale = gamma * jax.lax.rsqrt(var + BN_EPS)[None, :]                               # [1, Cp]
    shift = beta - gmean[None, :] * scale                                              # [1, Cp]
    return scale, shift


def _bn_act(y_raw, scale, shift, *, tm, tn, use_lrelu, out_dtype):
    Mp, Cp = y_raw.shape
    gm, gn = Mp // tm, Cp // tn
    kern = functools.partial(_bn_act_kernel, use_lrelu=use_lrelu)
    osize = jnp.dtype(out_dtype).itemsize
    vmem = _vmem_limit([(tm * tn * 4, 2), (tn * 4, 4), (tm * tn * osize, 2)])
    return pl.pallas_call(
        kern,
        out_shape=jax.ShapeDtypeStruct((Mp, Cp), out_dtype),
        grid=(gn, gm),
        in_specs=[pl.BlockSpec((tm, tn), lambda n, m: (m, n)),
                  pl.BlockSpec((1, tn), lambda n, m: (0, n)),
                  pl.BlockSpec((1, tn), lambda n, m: (0, n))],
        out_specs=pl.BlockSpec((tm, tn), lambda n, m: (m, n)),
        compiler_params=pltpu.CompilerParams(
            dimension_semantics=("parallel", "parallel"),
            vmem_limit_bytes=vmem),
    )(y_raw, scale, shift)


def _gemm_bias_act(patches, w_mat, bias, *, tm, tn, use_bias, use_lrelu, out_dtype):
    Mp, K = patches.shape
    Cp = w_mat.shape[1]
    gm, gn = Mp // tm, Cp // tn
    osize = jnp.dtype(out_dtype).itemsize
    in_specs = [pl.BlockSpec((tm, K), lambda n, m: (m, 0)),
                pl.BlockSpec((K, tn), lambda n, m: (0, n))]
    args = [patches, w_mat]
    if use_bias:
        in_specs.append(pl.BlockSpec((1, tn), lambda n, m: (0, n)))
        args.append(bias)
    kern = functools.partial(_gemm_bias_act_kernel, use_bias=use_bias, use_lrelu=use_lrelu)
    vmem = _vmem_limit([(tm * K * 2, 2), (K * tn * 2, 2), (tn * 4, 2), (tm * tn * osize, 2)])
    return pl.pallas_call(
        kern,
        out_shape=jax.ShapeDtypeStruct((Mp, Cp), out_dtype),
        grid=(gn, gm),
        in_specs=in_specs,
        out_specs=pl.BlockSpec((tm, tn), lambda n, m: (m, n)),
        compiler_params=pltpu.CompilerParams(
            dimension_semantics=("parallel", "parallel"),
            vmem_limit_bytes=vmem),
    )(*args)


# ------------------------------- JAX glue ------------------------------------
def _im2col_nhwc(x_nhwc, k, stride, pad):
    """NHWC im2col, (kh, kw, cin)-major K ordering (matches HWIO-flattened weights)."""
    N, H, W, C = x_nhwc.shape
    xp = jnp.pad(x_nhwc, ((0, 0), (pad, pad), (pad, pad), (0, 0)))
    Hp, Wp = H + 2 * pad, W + 2 * pad
    Ho = (Hp - k) // stride + 1
    Wo = (Wp - k) // stride + 1
    cols = []
    for i in range(k):
        for j in range(k):
            cols.append(xp[:, i:i + stride * (Ho - 1) + 1:stride,
                              j:j + stride * (Wo - 1) + 1:stride, :])   # [N, Ho, Wo, C]
    p = jnp.stack(cols, axis=3)                                         # [N, Ho, Wo, k*k, C]
    return p.reshape(N * Ho * Wo, k * k * C), (N, Ho, Wo)
    # TODO(synk): replace materialized im2col with in-kernel shifted-strip DMAs (memory_space=pl.ANY).


def nlayer_discriminator_forward(x_nchw, packed_params, configs):
    """x_nchw: [N, input_nc, H, W] float32. Returns [N, 1, H', W'] float32 (no sigmoid)."""
    x = jnp.transpose(x_nchw, (0, 2, 3, 1)).astype(jnp.bfloat16)       # NHWC bf16 between layers
    n_conv = len(configs)
    for li, ((w_mat, b, g, bt, cout), (stride, use_bias, use_bn, use_lrelu)) in enumerate(
            zip(packed_params, configs)):
        # Padded-row BN trick requires bias-free BN layers (true for BatchNorm2d norm_layer).
        assert not (use_bias and use_bn)
        patches, (N, Ho, Wo) = _im2col_nhwc(x, KW, stride, PADW)
        m_real, K = patches.shape
        cout_pad = w_mat.shape[1]
        tn = _choose_tn(cout_pad)
        tm = _choose_tm(m_real, K, tn)
        m_pad = _round_up(m_real, tm)
        if m_pad > m_real:
            patches = jnp.pad(patches, ((0, m_pad - m_real), (0, 0)))
        out_dtype = jnp.float32 if li == n_conv - 1 else jnp.bfloat16

        if use_bn:
            y_raw, stats = _gemm_stats(patches, w_mat, tm=tm, tn=tn, m_real=m_real)
            scale, shift = _combine_bn_stats(stats, g, bt, m_real, tm)
            y = _bn_act(y_raw, scale, shift, tm=tm, tn=tn, use_lrelu=use_lrelu,
                        out_dtype=out_dtype)
        else:
            y = _gemm_bias_act(patches, w_mat, b, tm=tm, tn=tn, use_bias=use_bias,
                               use_lrelu=use_lrelu, out_dtype=out_dtype)

        y = y[:m_real]
        if cout_pad != cout:
            # TODO(synk): carry lane-padded channels by zero-padding the next layer's K rows
            #             instead of slicing, where the extra GEMM FLOPs are small.
            y = y[:, :cout]
        x = y.reshape(N, Ho, Wo, y.shape[1])
    return jnp.transpose(x.astype(jnp.float32), (0, 3, 1, 2))          # NCHW only at the boundary


# --------------------------- parameter construction --------------------------
def make_params(key, input_nc, ndf, n_layers):
    # Channel plan follows NLayerDiscriminator.__init__ (BatchNorm2d norm -> use_bias=False).
    chans = [input_nc, ndf]
    for n in range(1, n_layers):
        chans.append(ndf * min(2 ** n, 8))
    chans.append(ndf * min(2 ** n_layers, 8))
    chans.append(1)

    n_conv = len(chans) - 1
    strides = [2] * n_layers + [1, 1]
    has_bias = [True] + [False] * (n_conv - 2) + [True]
    use_bn = [False] + [True] * (n_conv - 2) + [False]
    use_lrelu = [True] * (n_conv - 1) + [False]

    params, configs = [], []
    for li in range(n_conv):
        key, kw_, kb_, kg_, kbt_ = jax.random.split(key, 5)
        cin, cout = chans[li], chans[li + 1]
        w = 0.02 * jax.random.normal(kw_, (cout, cin, KW, KW), jnp.float32)
        b = (0.02 * jax.random.normal(kb_, (cout,), jnp.float32)
             if has_bias[li] else jnp.zeros((cout,), jnp.float32))
        g = 1.0 + 0.02 * jax.random.normal(kg_, (cout,), jnp.float32)   # BN affine (init_weights style)
        bt = 0.02 * jax.random.normal(kbt_, (cout,), jnp.float32)
        params.append((w, b, g, bt))
        configs.append((strides[li], has_bias[li], use_bn[li], use_lrelu[li]))
    return params, configs


def pack_params(raw_params):
    """One-time packing: HWIO-flattened bf16 weights + lane-padded per-channel vectors."""
    packed = []
    for (w, b, g, bt) in raw_params:
        cout, cin, k, _ = w.shape
        K = k * k * cin
        cout_pad = max(_round_up(cout, LANE), LANE)
        pad = cout_pad - cout
        w_mat = jnp.transpose(w, (2, 3, 1, 0)).reshape(K, cout)          # [K, Cout], (kh,kw,cin)-major
        w_mat = jnp.pad(w_mat, ((0, 0), (0, pad))).astype(jnp.bfloat16)  # lane-pad Cout -> mult of 128
        b_p = jnp.pad(b.reshape(1, cout), ((0, 0), (0, pad)))
        g_p = jnp.pad(g.reshape(1, cout), ((0, 0), (0, pad)))
        bt_p = jnp.pad(bt.reshape(1, cout), ((0, 0), (0, pad)))
        packed.append((w_mat, b_p, g_p, bt_p, cout))
    return packed


# ------------------------------ pure-JAX reference ---------------------------
def reference_forward(x, raw_params, configs):
    # Matches the kernel's numerics: bf16 conv operands with f32 accumulation, f32 BN.
    for (w, b, g, bt), (stride, use_bias, use_bn, use_lrelu) in zip(raw_params, configs):
        y = jax.lax.conv_general_dilated(
            x.astype(jnp.bfloat16), w.astype(jnp.bfloat16), (stride, stride),
            [(PADW, PADW), (PADW, PADW)],
            dimension_numbers=("NCHW", "OIHW", "NCHW"),
            preferred_element_type=jnp.float32)
        if use_bias:
            y = y + b[None, :, None, None]
        if use_bn:
            mean = jnp.mean(y, axis=(0, 2, 3), keepdims=True)
            var = jnp.mean(jnp.square(y - mean), axis=(0, 2, 3), keepdims=True)
            y = (y - mean) * jax.lax.rsqrt(var + BN_EPS) * g[None, :, None, None] + bt[None, :, None, None]
        if use_lrelu:
            y = jnp.where(y > 0, y, LRELU_SLOPE * y)
        x = y
    return x


if __name__ == "__main__":
    # 32x32 spatial keeps all 5 convs valid: 32 -> 16 -> 8 -> 4 -> 3 -> 2.
    input_nc, ndf, n_layers = 4, 8, 3
    N, H, W = 2, 32, 32

    key = jax.random.PRNGKey(0)
    key, kx = jax.random.split(key)
    x = jax.random.normal(kx, (N, input_nc, H, W), jnp.float32)

    raw_params, configs = make_params(key, input_nc, ndf, n_layers)
    packed = pack_params(raw_params)

    fwd = jax.jit(lambda xx: nlayer_discriminator_forward(xx, packed, configs))
    out = jax.block_until_ready(fwd(x))

    ref = jax.block_until_ready(reference_forward(x, raw_params, configs))
    assert out.shape == ref.shape == (N, 1, 2, 2), (out.shape, ref.shape)
    max_err = float(jnp.max(jnp.abs(out - ref)))
    assert jnp.allclose(out, ref, atol=1e-2, rtol=1e-2), max_err

    print("KERNEL_OK")
</pallas_src>

<mosaic_0001>
module attributes {stable_mosaic.version = 11 : i64} {
  func.func @_gemm_bias_act_kernel(%arg0: i32, %arg1: i32, %arg2: memref<512x64xbf16, #tpu.memory_space<vmem>>, %arg3: memref<64x128xbf16, #tpu.memory_space<vmem>>, %arg4: memref<1x128xf32, #tpu.memory_space<vmem>>, %arg5: memref<512x128xbf16, #tpu.memory_space<vmem>>) attributes {dimension_semantics = [#tpu.dimension_semantics<parallel>, #tpu.dimension_semantics<parallel>], iteration_bounds = array<i64: 1, 1>, scalar_prefetch = 0 : i64, scratch_operands = 0 : i64, tpu.core_type = #tpu.core_type<tc>, window_params = [{transform_indices = @transform_0, window_bounds = array<i64: 512, 64>}, {transform_indices = @transform_1, window_bounds = array<i64: 64, 128>}, {transform_indices = @transform_2, window_bounds = array<i64: 1, 128>}, {transform_indices = @transform_3, window_bounds = array<i64: 512, 128>}]} {
    %c0 = arith.constant 0 : index
    %c0_0 = arith.constant 0 : index
    %0 = vector.load %arg2[%c0, %c0_0] : memref<512x64xbf16, #tpu.memory_space<vmem>>, vector<512x64xbf16>
    %c0_1 = arith.constant 0 : index
    %c0_2 = arith.constant 0 : index
    %1 = vector.load %arg3[%c0_1, %c0_2] : memref<64x128xbf16, #tpu.memory_space<vmem>>, vector<64x128xbf16>
    %cst = arith.constant dense<0.000000e+00> : vector<512x128xf32>
    %2 = tpu.matmul %0, %1, %cst {dimension_numbers = #tpu.dot_dimension_numbers<[1], [0], [0], [1], [0, 0, 1, 1], [], []>} : vector<512x64xbf16>, vector<64x128xbf16>, vector<512x128xf32> -> vector<512x128xf32>
    %c0_3 = arith.constant 0 : index
    %c0_4 = arith.constant 0 : index
    %3 = vector.load %arg4[%c0_3, %c0_4] : memref<1x128xf32, #tpu.memory_space<vmem>>, vector<1x128xf32>
    %4 = vector.broadcast %3 : vector<1x128xf32> to vector<512x128xf32>
    %5 = arith.addf %2, %4 : vector<512x128xf32>
    %cst_5 = arith.constant 0.000000e+00 : f32
    %6 = vector.broadcast %cst_5 : f32 to vector<512x128xf32>
    %7 = arith.cmpf ogt, %5, %6 : vector<512x128xf32>
    %cst_6 = arith.constant 2.000000e-01 : f32
    %8 = vector.broadcast %cst_6 : f32 to vector<512x128xf32>
    %9 = arith.mulf %8, %5 : vector<512x128xf32>
    %10 = arith.select %7, %5, %9 : vector<512x128xi1>, vector<512x128xf32>
    %11 = arith.truncf %10 : vector<512x128xf32> to vector<512x128xbf16>
    %c0_7 = arith.constant 0 : index
    %c0_8 = arith.constant 0 : index
    %12 = vector.load %arg5[%c0_7, %c0_8] : memref<512x128xbf16, #tpu.memory_space<vmem>>, vector<512x128xbf16>
    tpu.vector_store %arg5[%c0_7, %c0_8], %11 {strides = array<i32>} : memref<512x128xbf16, #tpu.memory_space<vmem>>, vector<512x128xbf16>,
    return
  }
  func.func @transform_0(%arg0: i32, %arg1: i32) -> (i32, i32) {
    %c0_i32 = arith.constant 0 : i32
    %c0_i32_0 = arith.constant 0 : i32
    return %arg1, %c0_i32 : i32, i32
  }
  func.func @transform_1(%arg0: i32, %arg1: i32) -> (i32, i32) {
    %c0_i32 = arith.constant 0 : i32
    %c0_i32_0 = arith.constant 0 : i32
    return %c0_i32, %arg0 : i32, i32
  }
  func.func @transform_2(%arg0: i32, %arg1: i32) -> (i32, i32) {
    %c0_i32 = arith.constant 0 : i32
    %c0_i32_0 = arith.constant 0 : i32
    return %c0_i32, %arg0 : i32, i32
  }
  func.func @transform_3(%arg0: i32, %arg1: i32) -> (i32, i32) {
    %c0_i32 = arith.constant 0 : i32
    return %arg1, %arg0 : i32, i32
  }
}

module attributes {stable_mosaic.version = 11 : i64} {
  func.func @_gemm_stats_kernel(%arg0: i32, %arg1: i32, %arg2: memref<128x128xbf16, #tpu.memory_space<vmem>>, %arg3: memref<128x128xbf16, #tpu.memory_space<vmem>>, %arg4: memref<128x128xf32, #tpu.memory_space<vmem>>, %arg5: memref<1x2x128xf32, #tpu.memory_space<vmem>>) attributes {dimension_semantics = [#tpu.dimension_semantics<parallel>, #tpu.dimension_semantics<parallel>], iteration_bounds = array<i64: 1, 1>, scalar_prefetch = 0 : i64, scratch_operands = 0 : i64, tpu.core_type = #tpu.core_type<tc>, window_params = [{transform_indices = @transform_0, window_bounds = array<i64: 128, 128>}, {transform_indices = @transform_1, window_bounds = array<i64: 128, 128>}, {transform_indices = @transform_2, window_bounds = array<i64: 128, 128>}, {transform_indices = @transform_3, window_bounds = array<i64: 1, 2, 128>}]} {
    %c0 = arith.constant 0 : index
    %c0_0 = arith.constant 0 : index
    %0 = vector.load %arg2[%c0, %c0_0] : memref<128x128xbf16, #tpu.memory_space<vmem>>, vector<128x128xbf16>
    %c0_1 = arith.constant 0 : index
    %c0_2 = arith.constant 0 : index
    %1 = vector.load %arg3[%c0_1, %c0_2] : memref<128x128xbf16, #tpu.memory_space<vmem>>, vector<128x128xbf16>
    %cst = arith.constant dense<0.000000e+00> : vector<128x128xf32>
    %2 = tpu.matmul %0, %1, %cst {dimension_numbers = #tpu.dot_dimension_numbers<[1], [0], [0], [1], [0, 0, 1, 1], [], []>} : vector<128x128xbf16>, vector<128x128xbf16>, vector<128x128xf32> -> vector<128x128xf32>
    %c0_3 = arith.constant 0 : index
    %c0_4 = arith.constant 0 : index
    %3 = vector.load %arg4[%c0_3, %c0_4] : memref<128x128xf32, #tpu.memory_space<vmem>>, vector<128x128xf32>
    tpu.vector_store %arg4[%c0_3, %c0_4], %2 {strides = array<i32>} : memref<128x128xf32, #tpu.memory_space<vmem>>, vector<128x128xf32>,
    %cst_5 = arith.constant dense<0.000000e+00> : vector<128xf32>
    %4 = vector.multi_reduction <add>, %2, %cst_5 [0] : vector<128x128xf32> to vector<128xf32>
    %5 = vector.shape_cast %4 : vector<128xf32> to vector<1x128xf32>
    %cst_6 = arith.constant 7.812500e-03 : f32
    %6 = vector.broadcast %cst_6 : f32 to vector<1x128xf32>
    %7 = arith.mulf %5, %6 : vector<1x128xf32>
    %8 = vector.broadcast %7 : vector<1x128xf32> to vector<128x128xf32>
    %9 = arith.subf %2, %8 : vector<128x128xf32>
    %10 = arith.mulf %9, %9 : vector<128x128xf32>
    %cst_7 = arith.constant dense<0.000000e+00> : vector<128xf32>
    %11 = vector.multi_reduction <add>, %10, %cst_7 [0] : vector<128x128xf32> to vector<128xf32>
    %12 = vector.shape_cast %11 : vector<128xf32> to vector<1x128xf32>
    %13 = tpu.concatenate %5, %12 in 0 : vector<1x128xf32>, vector<1x128xf32> -> vector<2x128xf32>
    %14 = vector.shape_cast %13 : vector<2x128xf32> to vector<1x2x128xf32>
    %c0_8 = arith.constant 0 : index
    %c0_9 = arith.constant 0 : index
    %c0_10 = arith.constant 0 : index
    %15 = vector.load %arg5[%c0_8, %c0_9, %c0_10] : memref<1x2x128xf32, #tpu.memory_space<vmem>>, vector<1x2x128xf32>
    tpu.vector_store %arg5[%c0_8, %c0_9, %c0_10], %14 {strides = array<i32>} : memref<1x2x128xf32, #tpu.memory_space<vmem>>, vector<1x2x128xf32>,
    return
  }
  func.func @transform_0(%arg0: i32, %arg1: i32) -> (i32, i32) {
    %c0_i32 = arith.constant 0 : i32
    %c0_i32_0 = arith.constant 0 : i32
    return %arg1, %c0_i32 : i32, i32
  }
  func.func @transform_1(%arg0: i32, %arg1: i32) -> (i32, i32) {
    %c0_i32 = arith.constant 0 : i32
    %c0_i32_0 = arith.constant 0 : i32
    return %c0_i32, %arg0 : i32, i32
  }
  func.func @transform_2(%arg0: i32, %arg1: i32) -> (i32, i32) {
    %c0_i32 = arith.constant 0 : i32
    return %arg1, %arg0 : i32, i32
  }
  func.func @transform_3(%arg0: i32, %arg1: i32) -> (i32, i32, i32) {
    %c0_i32 = arith.constant 0 : i32
    %c0_i32_0 = arith.constant 0 : i32
    return %arg1, %c0_i32, %arg0 : i32, i32, i32
  }
}

module attributes {stable_mosaic.version = 11 : i64} {
  func.func @_bn_act_kernel(%arg0: i32, %arg1: i32, %arg2: memref<128x128xf32, #tpu.memory_space<vmem>>, %arg3: memref<1x128xf32, #tpu.memory_space<vmem>>, %arg4: memref<1x128xf32, #tpu.memory_space<vmem>>, %arg5: memref<128x128xbf16, #tpu.memory_space<vmem>>) attributes {dimension_semantics = [#tpu.dimension_semantics<parallel>, #tpu.dimension_semantics<parallel>], iteration_bounds = array<i64: 1, 1>, scalar_prefetch = 0 : i64, scratch_operands = 0 : i64, tpu.core_type = #tpu.core_type<tc>, window_params = [{transform_indices = @transform_0, window_bounds = array<i64: 128, 128>}, {transform_indices = @transform_1, window_bounds = array<i64: 1, 128>}, {transform_indices = @transform_2, window_bounds = array<i64: 1, 128>}, {transform_indices = @transform_3, window_bounds = array<i64: 128, 128>}]} {
    %c0 = arith.constant 0 : index
    %c0_0 = arith.constant 0 : index
    %0 = vector.load %arg2[%c0, %c0_0] : memref<128x128xf32, #tpu.memory_space<vmem>>, vector<128x128xf32>
    %c0_1 = arith.constant 0 : index
    %c0_2 = arith.constant 0 : index
    %1 = vector.load %arg3[%c0_1, %c0_2] : memref<1x128xf32, #tpu.memory_space<vmem>>, vector<1x128xf32>
    %2 = vector.broadcast %1 : vector<1x128xf32> to vector<128x128xf32>
    %3 = arith.mulf %0, %2 : vector<128x128xf32>
    %c0_3 = arith.constant 0 : index
    %c0_4 = arith.constant 0 : index
    %4 = vector.load %arg4[%c0_3, %c0_4] : memref<1x128xf32, #tpu.memory_space<vmem>>, vector<1x128xf32>
    %5 = vector.broadcast %4 : vector<1x128xf32> to vector<128x128xf32>
    %6 = arith.addf %3, %5 : vector<128x128xf32>
    %cst = arith.constant 0.000000e+00 : f32
    %7 = vector.broadcast %cst : f32 to vector<128x128xf32>
    %8 = arith.cmpf ogt, %6, %7 : vector<128x128xf32>
    %cst_5 = arith.constant 2.000000e-01 : f32
    %9 = vector.broadcast %cst_5 : f32 to vector<128x128xf32>
    %10 = arith.mulf %9, %6 : vector<128x128xf32>
    %11 = arith.select %8, %6, %10 : vector<128x128xi1>, vector<128x128xf32>
    %12 = arith.truncf %11 : vector<128x128xf32> to vector<128x128xbf16>
    %c0_6 = arith.constant 0 : index
    %c0_7 = arith.constant 0 : index
    %13 = vector.load %arg5[%c0_6, %c0_7] : memref<128x128xbf16, #tpu.memory_space<vmem>>, vector<128x128xbf16>
    tpu.vector_store %arg5[%c0_6, %c0_7], %12 {strides = array<i32>} : memref<128x128xbf16, #tpu.memory_space<vmem>>, vector<128x128xbf16>,
    return
  }
  func.func @transform_0(%arg0: i32, %arg1: i32) -> (i32, i32) {
    %c0_i32 = arith.constant 0 : i32
    return %arg1, %arg0 : i32, i32
  }
  func.func @transform_1(%arg0: i32, %arg1: i32) -> (i32, i32) {
    %c0_i32 = arith.constant 0 : i32
    %c0_i32_0 = arith.constant 0 : i32
    return %c0_i32, %arg0 : i32, i32
  }
  func.func @transform_2(%arg0: i32, %arg1: i32) -> (i32, i32) {
    %c0_i32 = arith.constant 0 : i32
    %c0_i32_0 = arith.constant 0 : i32
    return %c0_i32, %arg0 : i32, i32
  }
  func.func @transform_3(%arg0: i32, %arg1: i32) -> (i32, i32) {
    %c0_i32 = arith.constant 0 : i32
    return %arg1, %arg0 : i32, i32
  }
}

module attributes {stable_mosaic.version = 11 : i64} {
  func.func @_gemm_stats_kernel(%arg0: i32, %arg1: i32, %arg2: memref<32x256xbf16, #tpu.memory_space<vmem>>, %arg3: memref<256x128xbf16, #tpu.memory_space<vmem>>, %arg4: memref<32x128xf32, #tpu.memory_space<vmem>>, %arg5: memref<1x2x128xf32, #tpu.memory_space<vmem>>) attributes {dimension_semantics = [#tpu.dimension_semantics<parallel>, #tpu.dimension_semantics<parallel>], iteration_bounds = array<i64: 1, 1>, scalar_prefetch = 0 : i64, scratch_operands = 0 : i64, tpu.core_type = #tpu.core_type<tc>, window_params = [{transform_indices = @transform_0, window_bounds = array<i64: 32, 256>}, {transform_indices = @transform_1, window_bounds = array<i64: 256, 128>}, {transform_indices = @transform_2, window_bounds = array<i64: 32, 128>}, {transform_indices = @transform_3, window_bounds = array<i64: 1, 2, 128>}]} {
    %c0 = arith.constant 0 : index
    %c0_0 = arith.constant 0 : index
    %0 = vector.load %arg2[%c0, %c0_0] : memref<32x256xbf16, #tpu.memory_space<vmem>>, vector<32x256xbf16>
    %c0_1 = arith.constant 0 : index
    %c0_2 = arith.constant 0 : index
    %1 = vector.load %arg3[%c0_1, %c0_2] : memref<256x128xbf16, #tpu.memory_space<vmem>>, vector<256x128xbf16>
    %cst = arith.constant dense<0.000000e+00> : vector<32x128xf32>
    %2 = tpu.matmul %0, %1, %cst {dimension_numbers = #tpu.dot_dimension_numbers<[1], [0], [0], [1], [0, 0, 1, 1], [], []>} : vector<32x256xbf16>, vector<256x128xbf16>, vector<32x128xf32> -> vector<32x128xf32>
    %c0_3 = arith.constant 0 : index
    %c0_4 = arith.constant 0 : index
    %3 = vector.load %arg4[%c0_3, %c0_4] : memref<32x128xf32, #tpu.memory_space<vmem>>, vector<32x128xf32>
    tpu.vector_store %arg4[%c0_3, %c0_4], %2 {strides = array<i32>} : memref<32x128xf32, #tpu.memory_space<vmem>>, vector<32x128xf32>,
    %cst_5 = arith.constant dense<0.000000e+00> : vector<128xf32>
    %4 = vector.multi_reduction <add>, %2, %cst_5 [0] : vector<32x128xf32> to vector<128xf32>
    %5 = vector.shape_cast %4 : vector<128xf32> to vector<1x128xf32>
    %cst_6 = arith.constant 3.125000e-02 : f32
    %6 = vector.broadcast %cst_6 : f32 to vector<1x128xf32>
    %7 = arith.mulf %5, %6 : vector<1x128xf32>
    %8 = vector.broadcast %7 : vector<1x128xf32> to vector<32x128xf32>
    %9 = arith.subf %2, %8 : vector<32x128xf32>
    %10 = arith.mulf %9, %9 : vector<32x128xf32>
    %cst_7 = arith.constant dense<0.000000e+00> : vector<128xf32>
    %11 = vector.multi_reduction <add>, %10, %cst_7 [0] : vector<32x128xf32> to vector<128xf32>
    %12 = vector.shape_cast %11 : vector<128xf32> to vector<1x128xf32>
    %13 = tpu.concatenate %5, %12 in 0 : vector<1x128xf32>, vector<1x128xf32> -> vector<2x128xf32>
    %14 = vector.shape_cast %13 : vector<2x128xf32> to vector<1x2x128xf32>
    %c0_8 = arith.constant 0 : index
    %c0_9 = arith.constant 0 : index
    %c0_10 = arith.constant 0 : index
    %15 = vector.load %arg5[%c0_8, %c0_9, %c0_10] : memref<1x2x128xf32, #tpu.memory_space<vmem>>, vector<1x2x128xf32>
    tpu.vector_store %arg5[%c0_8, %c0_9, %c0_10], %14 {strides = array<i32>} : memref<1x2x128xf32, #tpu.memory_space<vmem>>, vector<1x2x128xf32>,
    return
  }
  func.func @transform_0(%arg0: i32, %arg1: i32) -> (i32, i32) {
    %c0_i32 = arith.constant 0 : i32
    %c0_i32_0 = arith.constant 0 : i32
    return %arg1, %c0_i32 : i32, i32
  }
  func.func @transform_1(%arg0: i32, %arg1: i32) -> (i32, i32) {
    %c0_i32 = arith.constant 0 : i32
    %c0_i32_0 = arith.constant 0 : i32
    return %c0_i32, %arg0 : i32, i32
  }
  func.func @transform_2(%arg0: i32, %arg1: i32) -> (i32, i32) {
    %c0_i32 = arith.constant 0 : i32
    return %arg1, %arg0 : i32, i32
  }
  func.func @transform_3(%arg0: i32, %arg1: i32) -> (i32, i32, i32) {
    %c0_i32 = arith.constant 0 : i32
    %c0_i32_0 = arith.constant 0 : i32
    return %arg1, %c0_i32, %arg0 : i32, i32, i32
  }
}

module attributes {stable_mosaic.version = 11 : i64} {
  func.func @_bn_act_kernel(%arg0: i32, %arg1: i32, %arg2: memref<32x128xf32, #tpu.memory_space<vmem>>, %arg3: memref<1x128xf32, #tpu.memory_space<vmem>>, %arg4: memref<1x128xf32, #tpu.memory_space<vmem>>, %arg5: memref<32x128xbf16, #tpu.memory_space<vmem>>) attributes {dimension_semantics = [#tpu.dimension_semantics<parallel>, #tpu.dimension_semantics<parallel>], iteration_bounds = array<i64: 1, 1>, scalar_prefetch = 0 : i64, scratch_operands = 0 : i64, tpu.core_type = #tpu.core_type<tc>, window_params = [{transform_indices = @transform_0, window_bounds = array<i64: 32, 128>}, {transform_indices = @transform_1, window_bounds = array<i64: 1, 128>}, {transform_indices = @transform_2, window_bounds = array<i64: 1, 128>}, {transform_indices = @transform_3, window_bounds = array<i64: 32, 128>}]} {
    %c0 = arith.constant 0 : index
    %c0_0 = arith.constant 0 : index
    %0 = vector.load %arg2[%c0, %c0_0] : memref<32x128xf32, #tpu.memory_space<vmem>>, vector<32x128xf32>
    %c0_1 = arith.constant 0 : index
    %c0_2 = arith.constant 0 : index
    %1 = vector.load %arg3[%c0_1, %c0_2] : memref<1x128xf32, #tpu.memory_space<vmem>>, vector<1x128xf32>
    %2 = vector.broadcast %1 : vector<1x128xf32> to vector<32x128xf32>
    %3 = arith.mulf %0, %2 : vector<32x128xf32>
    %c0_3 = arith.constant 0 : index
    %c0_4 = arith.constant 0 : index
    %4 = vector.load %arg4[%c0_3, %c0_4] : memref<1x128xf32, #tpu.memory_space<vmem>>, vector<1x128xf32>
    %5 = vector.broadcast %4 : vector<1x128xf32> to vector<32x128xf32>
    %6 = arith.addf %3, %5 : vector<32x128xf32>
    %cst = arith.constant 0.000000e+00 : f32
    %7 = vector.broadcast %cst : f32 to vector<32x128xf32>
    %8 = arith.cmpf ogt, %6, %7 : vector<32x128xf32>
    %cst_5 = arith.constant 2.000000e-01 : f32
    %9 = vector.broadcast %cst_5 : f32 to vector<32x128xf32>
    %10 = arith.mulf %9, %6 : vector<32x128xf32>
    %11 = arith.select %8, %6, %10 : vector<32x128xi1>, vector<32x128xf32>
    %12 = arith.truncf %11 : vector<32x128xf32> to vector<32x128xbf16>
    %c0_6 = arith.constant 0 : index
    %c0_7 = arith.constant 0 : index
    %13 = vector.load %arg5[%c0_6, %c0_7] : memref<32x128xbf16, #tpu.memory_space<vmem>>, vector<32x128xbf16>
    tpu.vector_store %arg5[%c0_6, %c0_7], %12 {strides = array<i32>} : memref<32x128xbf16, #tpu.memory_space<vmem>>, vector<32x128xbf16>,
    return
  }
  func.func @transform_0(%arg0: i32, %arg1: i32) -> (i32, i32) {
    %c0_i32 = arith.constant 0 : i32
    return %arg1, %arg0 : i32, i32
  }
  func.func @transform_1(%arg0: i32, %arg1: i32) -> (i32, i32) {
    %c0_i32 = arith.constant 0 : i32
    %c0_i32_0 = arith.constant 0 : i32
    return %c0_i32, %arg0 : i32, i32
  }
  func.func @transform_2(%arg0: i32, %arg1: i32) -> (i32, i32) {
    %c0_i32 = arith.constant 0 : i32
    %c0_i32_0 = arith.constant 0 : i32
    return %c0_i32, %arg0 : i32, i32
  }
  func.func @transform_3(%arg0: i32, %arg1: i32) -> (i32, i32) {
    %c0_i32 = arith.constant 0 : i32
    return %arg1, %arg0 : i32, i32
  }
}

module attributes {stable_mosaic.version = 11 : i64} {
  func.func @_gemm_stats_kernel(%arg0: i32, %arg1: i32, %arg2: memref<32x512xbf16, #tpu.memory_space<vmem>>, %arg3: memref<512x128xbf16, #tpu.memory_space<vmem>>, %arg4: memref<32x128xf32, #tpu.memory_space<vmem>>, %arg5: memref<1x2x128xf32, #tpu.memory_space<vmem>>) attributes {dimension_semantics = [#tpu.dimension_semantics<parallel>, #tpu.dimension_semantics<parallel>], iteration_bounds = array<i64: 1, 1>, scalar_prefetch = 0 : i64, scratch_operands = 0 : i64, tpu.core_type = #tpu.core_type<tc>, window_params = [{transform_indices = @transform_0, window_bounds = array<i64: 32, 512>}, {transform_indices = @transform_1, window_bounds = array<i64: 512, 128>}, {transform_indices = @transform_2, window_bounds = array<i64: 32, 128>}, {transform_indices = @transform_3, window_bounds = array<i64: 1, 2, 128>}]} {
    %c0 = arith.constant 0 : index
    %c0_0 = arith.constant 0 : index
    %0 = vector.load %arg2[%c0, %c0_0] : memref<32x512xbf16, #tpu.memory_space<vmem>>, vector<32x512xbf16>
    %c0_1 = arith.constant 0 : index
    %c0_2 = arith.constant 0 : index
    %1 = vector.load %arg3[%c0_1, %c0_2] : memref<512x128xbf16, #tpu.memory_space<vmem>>, vector<512x128xbf16>
    %cst = arith.constant dense<0.000000e+00> : vector<32x128xf32>
    %2 = tpu.matmul %0, %1, %cst {dimension_numbers = #tpu.dot_dimension_numbers<[1], [0], [0], [1], [0, 0, 1, 1], [], []>} : vector<32x512xbf16>, vector<512x128xbf16>, vector<32x128xf32> -> vector<32x128xf32>
    %c0_3 = arith.constant 0 : index
    %c0_4 = arith.constant 0 : index
    %3 = vector.load %arg4[%c0_3, %c0_4] : memref<32x128xf32, #tpu.memory_space<vmem>>, vector<32x128xf32>
    tpu.vector_store %arg4[%c0_3, %c0_4], %2 {strides = array<i32>} : memref<32x128xf32, #tpu.memory_space<vmem>>, vector<32x128xf32>,
    %c32_i32 = arith.constant 32 : i32
    %4 = arith.muli %arg1, %c32_i32 : i32
    %5 = tpu.iota {dimensions = array<i32: 0>} : vector<32x128xi32>
    %6 = vector.broadcast %4 : i32 to vector<32x128xi32>
    %7 = arith.addi %6, %5 : vector<32x128xi32>
    %c18_i32 = arith.constant 18 : i32
    %8 = vector.broadcast %c18_i32 : i32 to vector<32x128xi32>
    %9 = arith.cmpi slt, %7, %8 : vector<32x128xi32>
    %cst_5 = arith.constant 0.000000e+00 : f32
    %10 = vector.broadcast %cst_5 : f32 to vector<32x128xf32>
    %11 = arith.select %9, %2, %10 : vector<32x128xi1>, vector<32x128xf32>
    %12 = arith.sitofp %arg1 : i32 to f32
    %cst_6 = arith.constant 3.200000e+01 : f32
    %13 = arith.mulf %12, %cst_6 : f32
    %cst_7 = arith.constant 1.800000e+01 : f32
    %14 = arith.subf %cst_7, %13 : f32
    %cst_8 = arith.constant 3.200000e+01 : f32
    %15 = arith.minimumf %cst_8, %14 : f32
    %cst_9 = arith.constant dense<0.000000e+00> : vector<128xf32>
    %16 = vector.multi_reduction <add>, %11, %cst_9 [0] : vector<32x128xf32> to vector<128xf32>
    %17 = vector.shape_cast %16 : vector<128xf32> to vector<1x128xf32>
    %18 = vector.broadcast %15 : f32 to vector<1x128xf32>
    %19 = arith.divf %17, %18 : vector<1x128xf32>
    %20 = vector.broadcast %19 : vector<1x128xf32> to vector<32x128xf32>
    %21 = arith.subf %2, %20 : vector<32x128xf32>
    %cst_10 = arith.constant 0.000000e+00 : f32
    %22 = vector.broadcast %cst_10 : f32 to vector<32x128xf32>
    %23 = arith.select %9, %21, %22 : vector<32x128xi1>, vector<32x128xf32>
    %24 = arith.mulf %23, %23 : vector<32x128xf32>
    %cst_11 = arith.constant dense<0.000000e+00> : vector<128xf32>
    %25 = vector.multi_reduction <add>, %24, %cst_11 [0] : vector<32x128xf32> to vector<128xf32>
    %26 = vector.shape_cast %25 : vector<128xf32> to vector<1x128xf32>
    %27 = tpu.concatenate %17, %26 in 0 : vector<1x128xf32>, vector<1x128xf32> -> vector<2x128xf32>
    %28 = vector.shape_cast %27 : vector<2x128xf32> to vector<1x2x128xf32>
    %c0_12 = arith.constant 0 : index
    %c0_13 = arith.constant 0 : index
    %c0_14 = arith.constant 0 : index
    %29 = vector.load %arg5[%c0_12, %c0_13, %c0_14] : memref<1x2x128xf32, #tpu.memory_space<vmem>>, vector<1x2x128xf32>
    tpu.vector_store %arg5[%c0_12, %c0_13, %c0_14], %28 {strides = array<i32>} : memref<1x2x128xf32, #tpu.memory_space<vmem>>, vector<1x2x128xf32>,
    return
  }
  func.func @transform_0(%arg0: i32, %arg1: i32) -> (i32, i32) {
    %c0_i32 = arith.constant 0 : i32
    %c0_i32_0 = arith.constant 0 : i32
    return %arg1, %c0_i32 : i32, i32
  }
  func.func @transform_1(%arg0: i32, %arg1: i32) -> (i32, i32) {
    %c0_i32 = arith.constant 0 : i32
    %c0_i32_0 = arith.constant 0 : i32
    return %c0_i32, %arg0 : i32, i32
  }
  func.func @transform_2(%arg0: i32, %arg1: i32) -> (i32, i32) {
    %c0_i32 = arith.constant 0 : i32
    return %arg1, %arg0 : i32, i32
  }
  func.func @transform_3(%arg0: i32, %arg1: i32) -> (i32, i32, i32) {
    %c0_i32 = arith.constant 0 : i32
    %c0_i32_0 = arith.constant 0 : i32
    return %arg1, %c0_i32, %arg0 : i32, i32, i32
  }
}

module attributes {stable_mosaic.version = 11 : i64} {
  func.func @_gemm_bias_act_kernel(%arg0: i32, %arg1: i32, %arg2: memref<16x1024xbf16, #tpu.memory_space<vmem>>, %arg3: memref<1024x128xbf16, #tpu.memory_space<vmem>>, %arg4: memref<1x128xf32, #tpu.memory_space<vmem>>, %arg5: memref<16x128xf32, #tpu.memory_space<vmem>>) attributes {dimension_semantics = [#tpu.dimension_semantics<parallel>, #tpu.dimension_semantics<parallel>], iteration_bounds = array<i64: 1, 1>, scalar_prefetch = 0 : i64, scratch_operands = 0 : i64, tpu.core_type = #tpu.core_type<tc>, window_params = [{transform_indices = @transform_0, window_bounds = array<i64: 16, 1024>}, {transform_indices = @transform_1, window_bounds = array<i64: 1024, 128>}, {transform_indices = @transform_2, window_bounds = array<i64: 1, 128>}, {transform_indices = @transform_3, window_bounds = array<i64: 16, 128>}]} {
    %c0 = arith.constant 0 : index
    %c0_0 = arith.constant 0 : index
    %0 = vector.load %arg2[%c0, %c0_0] : memref<16x1024xbf16, #tpu.memory_space<vmem>>, vector<16x1024xbf16>
    %c0_1 = arith.constant 0 : index
    %c0_2 = arith.constant 0 : index
    %1 = vector.load %arg3[%c0_1, %c0_2] : memref<1024x128xbf16, #tpu.memory_space<vmem>>, vector<1024x128xbf16>
    %cst = arith.constant dense<0.000000e+00> : vector<16x128xf32>
    %2 = tpu.matmul %0, %1, %cst {dimension_numbers = #tpu.dot_dimension_numbers<[1], [0], [0], [1], [0, 0, 1, 1], [], []>} : vector<16x1024xbf16>, vector<1024x128xbf16>, vector<16x128xf32> -> vector<16x128xf32>
    %c0_3 = arith.constant 0 : index
    %c0_4 = arith.constant 0 : index
    %3 = vector.load %arg4[%c0_3, %c0_4] : memref<1x128xf32, #tpu.memory_space<vmem>>, vector<1x128xf32>
    %4 = vector.broadcast %3 : vector<1x128xf32> to vector<16x128xf32>
    %5 = arith.addf %2, %4 : vector<16x128xf32>
    %c0_5 = arith.constant 0 : index
    %c0_6 = arith.constant 0 : index
    %6 = vector.load %arg5[%c0_5, %c0_6] : memref<16x128xf32, #tpu.memory_space<vmem>>, vector<16x128xf32>
    tpu.vector_store %arg5[%c0_5, %c0_6], %5 {strides = array<i32>} : memref<16x128xf32, #tpu.memory_space<vmem>>, vector<16x128xf32>,
    return
  }
  func.func @transform_0(%arg0: i32, %arg1: i32) -> (i32, i32) {
    %c0_i32 = arith.constant 0 : i32
    %c0_i32_0 = arith.constant 0 : i32
    return %arg1, %c0_i32 : i32, i32
  }
  func.func @transform_1(%arg0: i32, %arg1: i32) -> (i32, i32) {
    %c0_i32 = arith.constant 0 : i32
    %c0_i32_0 = arith.constant 0 : i32
    return %c0_i32, %arg0 : i32, i32
  }
  func.func @transform_2(%arg0: i32, %arg1: i32) -> (i32, i32) {
    %c0_i32 = arith.constant 0 : i32
    %c0_i32_0 = arith.constant 0 : i32
    return %c0_i32, %arg0 : i32, i32
  }
  func.func @transform_3(%arg0: i32, %arg1: i32) -> (i32, i32) {
    %c0_i32 = arith.constant 0 : i32
    return %arg1, %arg0 : i32, i32
  }
}

</mosaic_0001>

<bundles_post_ra>
// kernel: _lambda_.8
= control target key start
LH: loop header
LB: loop body
LE: loop exit
PB: predicated region body
PF: predicated region fallthrough
CT: control target
= control target key end

     0   :  { %vm278_vm0 = vcmask 523264   ;;  %s2054_s1 = inlined_call_operand.vmem [shape: bf16[64,128], index: 1, kind: input, shape index: {}]   ;;  %s2055_s0 = inlined_call_operand.vmem [shape: bf16[512,64], index: 0, kind: input, shape index: {}]   ;;  %s2056_s2 = inlined_call_operand.vmem [shape: f32[1,128], index: 2, kind: input, shape index: {}]   ;;  %s2057_s3 = inlined_call_operand.vmem [shape: bf16[512,128], index: 3, kind: output, shape index: {}]  }
   0x1   :  { %v1684_v0 = vld [vmem:[%s2054_s1] sm:$0xff]   ;;  %v1685_v1 = vld [vmem:[%s2054_s1 + $0x8] sm:$0xff]   ;;  %v1686_v2 = vld [vmem:[%s2054_s1 + $0x10] sm:$0xff]  }
   0x2   :  { %1604 = vmatprep.subr.bf16.mxu0 %v1684_v0  ;;  %1676 = vmatprep.subr.bf16.mxu1 %v1684_v0  ;;  %v1688_v3 = vld [vmem:[%s2055_s0] sm:$0xff]   ;;  %v1687_v5 = vld [vmem:[%s2054_s1 + $0x18] sm:$0xff]   ;;  %v1690_v6 = vld [vmem:[%s2055_s0 + $0x8] sm:$0xff]  }
   0x3   :  { %1605 = vmatpush3.bf16.msra.mxu0 %v1684_v0  ;;  %1680 = vmatpush3.bf16.msra.mxu1 %v1684_v0  ;;  %v1689_v4 = vld [vmem:[%s2055_s0 + $0x80] sm:$0xff]   ;;  %v1691_v7 = vld [vmem:[%s2055_s0 + $0x88] sm:$0xff]   ;;  %v1692_v8 = vld [vmem:[%s2055_s0 + $0x10] sm:$0xff]  }
   0x4   :  { %1606 = vmatprep.subr.bf16.mxu0 %v1685_v1  ;;  %1677 = vmatprep.subr.bf16.mxu1 %v1685_v1  ;;  %v1693_v9 = vld [vmem:[%s2055_s0 + $0x90] sm:$0xff]   ;;  %v1694_v10 = vld [vmem:[%s2055_s0 + $0x18] sm:$0xff]   ;;  %v1696_v12 = vld [vmem:[%s2055_s0 + $0x20] sm:$0xff]  }
   0x5   :  { %1612 = vmatprep.mubr.msk.bf16.mxu0 %vm278_vm0, %v1688_v3  ;;  %1644 = vmatprep.mubr.msk.bf16.mxu1 %vm278_vm0, %v1689_v4  ;;  %v1695_v11 = vld [vmem:[%s2055_s0 + $0x98] sm:$0xff]   ;;  %v1697_v13 = vld [vmem:[%s2055_s0 + $0xa0] sm:$0xff]   ;;  %v1698_v14 = vld [vmem:[%s2055_s0 + $0x28] sm:$0xff]  }
   0x6   :  { %v1699_v15 = vld [vmem:[%s2055_s0 + $0xa8] sm:$0xff]   ;;  %v1700_v16 = vld [vmem:[%s2055_s0 + $0x30] sm:$0xff]   ;;  %v1702_v18 = vld [vmem:[%s2055_s0 + $0x38] sm:$0xff]  }
   0x7   :  { %1607 = vmatpush3.bf16.msra.mxu0 %v1685_v1  ;;  %1681 = vmatpush3.bf16.msra.mxu1 %v1685_v1  ;;  %v1701_v17 = vld [vmem:[%s2055_s0 + $0xb0] sm:$0xff]   ;;  %v1703_v19 = vld [vmem:[%s2055_s0 + $0xb8] sm:$0xff]   ;;  %v1704_v20 = vld [vmem:[%s2055_s0 + $0x40] sm:$0xff]  }
   0x8   :  { %1608 = vmatprep.subr.bf16.mxu0 %v1686_v2  ;;  %1678 = vmatprep.subr.bf16.mxu1 %v1686_v2  ;;  %v1705_v21 = vld [vmem:[%s2055_s0 + $0xc0] sm:$0xff]   ;;  %v1706_v22 = vld [vmem:[%s2055_s0 + $0x48] sm:$0xff]   ;;  %v1708_v24 = vld [vmem:[%s2055_s0 + $0x50] sm:$0xff]  }
   0x9   :  { %v1707_v23 = vld [vmem:[%s2055_s0 + $0xc8] sm:$0xff]   ;;  %v1709_v25 = vld [vmem:[%s2055_s0 + $0xd0] sm:$0xff]   ;;  %v1710_v26 = vld [vmem:[%s2055_s0 + $0x58] sm:$0xff]  }
   0xa   :  { %v1711_v27 = vld [vmem:[%s2055_s0 + $0xd8] sm:$0xff]   ;;  %v1712_v28 = vld [vmem:[%s2055_s0 + $0x60] sm:$0xff]   ;;  %v1714_v30 = vld [vmem:[%s2055_s0 + $0x68] sm:$0xff]  }
   0xb   :  { %1609 = vmatpush3.bf16.msra.mxu0 %v1686_v2  ;;  %1682 = vmatpush3.bf16.msra.mxu1 %v1686_v2  ;;  %v1713_v29 = vld [vmem:[%s2055_s0 + $0xe0] sm:$0xff]   ;;  %v1715_v31 = vld [vmem:[%s2055_s0 + $0xe8] sm:$0xff]   ;;  %v1716_v32 = vld [vmem:[%s2055_s0 + $0x70] sm:$0xff]  }
   0xc   :  { %1610 = vmatprep.subr.bf16.mxu0 %v1687_v5  ;;  %1679 = vmatprep.subr.bf16.mxu1 %v1687_v5  ;;  %v1717_v33 = vld [vmem:[%s2055_s0 + $0xf0] sm:$0xff]   ;;  %v1718_v34 = vld [vmem:[%s2055_s0 + $0x78] sm:$0xff]   ;;  %v1883_v36 = vld [vmem:[%s2056_s2] ss:$0 sm:$0xff] }
   0xd   :  { %v1719_v35 = vld [vmem:[%s2055_s0 + $0xf8] sm:$0xff]  }
   0xf   :  { %1611 = vmatpush3.bf16.msra.mxu0 %v1687_v5  ;;  %1683 = vmatpush3.bf16.msra.mxu1 %v1687_v5 }
  0x12   :  { %1613 = vmatmul.mubr.msk.bf16.vlgmr.msra.gmra.mrb[0].mxu0 %vm278_vm0, %v1690_v6  ;;  %1645 = vmatmul.mubr.msk.bf16.vlgmr.msra.gmra.mrb[0].mxu1 %vm278_vm0, %v1691_v7 }
  0x13   :  { %1616 = vmatprep.mubr.msk.bf16.mxu0 %vm278_vm0, %v1692_v8  ;;  %1648 = vmatprep.mubr.msk.bf16.mxu1 %vm278_vm0, %v1693_v9 }
  0x1a   :  { %1617 = vmatmul.mubr.msk.bf16.gmra.mrb[4].mxu0 %vm278_vm0, %v1694_v10  ;;  %1649 = vmatmul.mubr.msk.bf16.gmra.mrb[4].mxu1 %vm278_vm0, %v1695_v11 }
  0x1b   :  { %1620 = vmatprep.mubr.msk.bf16.mxu0 %vm278_vm0, %v1696_v12  ;;  %1652 = vmatprep.mubr.msk.bf16.mxu1 %vm278_vm0, %v1697_v13 }
  0x22   :  { %1621 = vmatmul.mubr.msk.bf16.gmra.mrb[8].mxu0 %vm278_vm0, %v1698_v14  ;;  %1653 = vmatmul.mubr.msk.bf16.gmra.mrb[8].mxu1 %vm278_vm0, %v1699_v15 }
  0x23   :  { %1624 = vmatprep.mubr.msk.bf16.mxu0 %vm278_vm0, %v1700_v16  ;;  %1656 = vmatprep.mubr.msk.bf16.mxu1 %vm278_vm0, %v1701_v17 }
  0x2a   :  { %1625 = vmatmul.mubr.msk.bf16.gmra.mrb[12].mxu0 %vm278_vm0, %v1702_v18  ;;  %1657 = vmatmul.mubr.msk.bf16.gmra.mrb[12].mxu1 %vm278_vm0, %v1703_v19 }
  0x2b   :  { %1628 = vmatprep.mubr.msk.bf16.mxu0 %vm278_vm0, %v1704_v20  ;;  %1660 = vmatprep.mubr.msk.bf16.mxu1 %vm278_vm0, %v1705_v21 }
  0x32   :  { %1629 = vmatmul.mubr.msk.bf16.gmra.mrb[16].mxu0 %vm278_vm0, %v1706_v22  ;;  %1661 = vmatmul.mubr.msk.bf16.gmra.mrb[16].mxu1 %vm278_vm0, %v1707_v23 }
  0x33   :  { %1632 = vmatprep.mubr.msk.bf16.mxu0 %vm278_vm0, %v1708_v24  ;;  %1664 = vmatprep.mubr.msk.bf16.mxu1 %vm278_vm0, %v1709_v25 }
  0x3a   :  { %1633 = vmatmul.mubr.msk.bf16.gmra.mrb[20].mxu0 %vm278_vm0, %v1710_v26  ;;  %1665 = vmatmul.mubr.msk.bf16.gmra.mrb[20].mxu1 %vm278_vm0, %v1711_v27 }
  0x3b   :  { %1636 = vmatprep.mubr.msk.bf16.mxu0 %vm278_vm0, %v1712_v28  ;;  %1668 = vmatprep.mubr.msk.bf16.mxu1 %vm278_vm0, %v1713_v29 }
  0x42   :  { %1637 = vmatmul.mubr.msk.bf16.gmra.mrb[24].mxu0 %vm278_vm0, %v1714_v30  ;;  %1669 = vmatmul.mubr.msk.bf16.gmra.mrb[24].mxu1 %vm278_vm0, %v1715_v31 }
  0x43   :  { %1640 = vmatprep.mubr.msk.bf16.mxu0 %vm278_vm0, %v1716_v32  ;;  %1672 = vmatprep.mubr.msk.bf16.mxu1 %vm278_vm0, %v1717_v33 }
  0x4a   :  { %1641 = vmatmul.mubr.msk.bf16.gmra.mrb[28].mxu0 %vm278_vm0, %v1718_v34  ;;  %1673 = vmatmul.mubr.msk.bf16.gmra.mrb[28].mxu1 %vm278_vm0, %v1719_v35 }
  0xe5   :  { %v1614_v37 = vpop.f32.mrb[0].mxu0  ;;  %v1646_v38 = vpop.f32.mrb[0].mxu1 }
  0xe6   :  { %v418_v39 = vadd.f32 %v1614_v37, %v1883_v36  ;;  %v546_v40 = vadd.f32 %v1646_v38, %v1883_v36  ;;  %v409_v41 = vpop.f32.mrb[1].mxu0  ;;  %v537_v42 = vpop.f32.mrb[1].mxu1 }
  0xe7   :  { %v410_v43 = vadd.f32 %v1883_v36, %v409_v41  ;;  %v538_v44 = vadd.f32 %v1883_v36, %v537_v42  ;;  %v1615_v45 = vpop.f32.mrb[2].mxu0  ;;  %v1647_v46 = vpop.f32.mrb[2].mxu1 }
  0xe8   :  { %vm666_vm1 = vcmp.gt.f32.partialorder %v418_v39, 0.0  ;;  %v730_v47 = vmul.f32 0.2, %v418_v39  ;;  %vm698_vm2 = vcmp.gt.f32.partialorder %v546_v40, 0.0  ;;  %v762_v48 = vmul.f32 0.2, %v546_v40 }
  0xe9   :  { %vm664_vm3 = vcmp.gt.f32.partialorder %v410_v43, 0.0  ;;  %v728_v49 = vmul.f32 0.2, %v410_v43  ;;  %vm696_vm4 = vcmp.gt.f32.partialorder %v538_v44, 0.0  ;;  %v760_v50 = vmul.f32 0.2, %v538_v44 }
  0xea   :  { %v421_v51 = vadd.f32 %v1615_v45, %v1883_v36  ;;  %v549_v52 = vadd.f32 %v1647_v46, %v1883_v36  ;;  %v412_v53 = vpop.f32.mrb[3].mxu0  ;;  %v540_v54 = vpop.f32.mrb[3].mxu1  ;;  %v794_v55 = vsel %vm666_vm1, %v418_v39, %v730_v47  ;;  %v826_v56 = vsel %vm698_vm2, %v546_v40, %v762_v48 }
  0xeb   :  { %v413_v57 = vadd.f32 %v1883_v36, %v412_v53  ;;  %v541_v58 = vadd.f32 %v1883_v36, %v540_v54  ;;  %v792_v63 = vsel %vm664_vm3, %v410_v43, %v728_v49  ;;  %v824_v0 = vsel %vm696_vm4, %v538_v44, %v760_v50 }
  0xec   :  { %vm667_vm5 = vcmp.gt.f32.partialorder %v421_v51, 0.0  ;;  %v731_v59 = vmul.f32 0.2, %v421_v51  ;;  %vm699_vm6 = vcmp.gt.f32.partialorder %v549_v52, 0.0  ;;  %v763_v60 = vmul.f32 0.2, %v549_v52 }
  0xed   :  { %vm665_vm7 = vcmp.gt.f32.partialorder %v413_v57, 0.0  ;;  %v729_v61 = vmul.f32 0.2, %v413_v57  ;;  %vm697_vm8 = vcmp.gt.f32.partialorder %v541_v58, 0.0  ;;  %v761_v62 = vmul.f32 0.2, %v541_v58 }
  0xee   :  { %v795_v1 = vsel %vm667_vm5, %v421_v51, %v731_v59  ;;  %v827_v2 = vsel %vm699_vm6, %v549_v52, %v763_v60  ;;  %v1618_v3 = vpop.f32.mrb[4].mxu0  ;;  %v1650_v4 = vpop.f32.mrb[4].mxu1 }
  0xef   :  { %v1385_v5 = vpack.c.bf16 %v795_v1, %v794_v55  ;;  %v1465_v6 = vpack.c.bf16 %v827_v2, %v826_v56  ;;  %v793_v7 = vsel %vm665_vm7, %v413_v57, %v729_v61  ;;  %v825_v8 = vsel %vm697_vm8, %v541_v58, %v761_v62  ;;  %v425_v9 = vpop.f32.mrb[5].mxu0  ;;  %v553_v10 = vpop.f32.mrb[5].mxu1 }
  0xf0   :  { %v1380_v11 = vpack.c.bf16 %v793_v7, %v792_v63  ;;  %v1460_v12 = vpack.c.bf16 %v825_v8, %v824_v0  ;;  %v434_v13 = vadd.f32 %v1618_v3, %v1883_v36  ;;  %v562_v14 = vadd.f32 %v1650_v4, %v1883_v36  ;;  %v1619_v15 = vpop.f32.mrb[6].mxu0  ;;  %v1651_v16 = vpop.f32.mrb[6].mxu1 }
  0xf1   :  { %1537 = vst [vmem:[%s2057_s3 + $0x8] sm:$0xff] %v1385_v5   ;;  %1553 = vst [vmem:[%s2057_s3 + $0x88] sm:$0xff] %v1465_v6   ;;  %v426_v17 = vadd.f32 %v1883_v36, %v425_v9  ;;  %v554_v18 = vadd.f32 %v1883_v36, %v553_v10  ;;  %v437_v19 = vadd.f32 %v1619_v15, %v1883_v36  ;;  %v428_v21 = vpop.f32.mrb[7].mxu0  ;;  %v556_v22 = vpop.f32.mrb[7].mxu1 }
  0xf2   :  { %v565_v20 = vadd.f32 %v1651_v16, %v1883_v36  ;;  %1381 = vst [vmem:[%s2057_s3] sm:$0xff] %v1380_v11   ;;  %1552 = vst [vmem:[%s2057_s3 + $0x80] sm:$0xff] %v1460_v12   ;;  %vm670_vm9 = vcmp.gt.f32.partialorder %v434_v13, 0.0  ;;  %v734_v23 = vmul.f32 0.2, %v434_v13  ;;  %vm702_vm10 = vcmp.gt.f32.partialorder %v562_v14, 0.0 }
  0xf3   :  { %v766_v24 = vmul.f32 0.2, %v562_v14  ;;  %vm668_vm11 = vcmp.gt.f32.partialorder %v426_v17, 0.0  ;;  %v732_v25 = vmul.f32 0.2, %v426_v17  ;;  %vm700_vm12 = vcmp.gt.f32.partialorder %v554_v18, 0.0 }
  0xf4   :  { %v764_v26 = vmul.f32 0.2, %v554_v18  ;;  %v798_v27 = vsel %vm670_vm9, %v434_v13, %v734_v23  ;;  %vm671_vm13 = vcmp.gt.f32.partialorder %v437_v19, 0.0  ;;  %v735_v29 = vmul.f32 0.2, %v437_v19 }
  0xf5   :  { %v830_v28 = vsel %vm702_vm10, %v562_v14, %v766_v24  ;;  %v796_v30 = vsel %vm668_vm11, %v426_v17, %v732_v25  ;;  %vm703_vm14 = vcmp.gt.f32.partialorder %v565_v20, 0.0  ;;  %v767_v32 = vmul.f32 0.2, %v565_v20  ;;  %v1622_v33 = vpop.f32.mrb[8].mxu0  ;;  %v1654_v34 = vpop.f32.mrb[8].mxu1 }
  0xf6   :  { %v828_v31 = vsel %vm700_vm12, %v554_v18, %v764_v26  ;;  %v799_v35 = vsel %vm671_vm13, %v437_v19, %v735_v29  ;;  %v429_v37 = vadd.f32 %v1883_v36, %v428_v21  ;;  %v557_v38 = vadd.f32 %v1883_v36, %v556_v22  ;;  %v441_v40 = vpop.f32.mrb[9].mxu0  ;;  %v569_v41 = vpop.f32.mrb[9].mxu1 }
  0xf7   :  { %v450_v39 = vadd.f32 %v1622_v33, %v1883_v36  ;;  %v1395_v42 = vpack.c.bf16 %v799_v35, %v798_v27  ;;  %v831_v43 = vsel %vm703_vm14, %v565_v20, %v767_v32  ;;  %v578_v44 = vadd.f32 %v1654_v34, %v1883_v36  ;;  %v1623_v46 = vpop.f32.mrb[10].mxu0  ;;  %v1655_v47 = vpop.f32.mrb[10].mxu1 }
  0xf8   :  { %v442_v45 = vadd.f32 %v1883_v36, %v441_v40  ;;  %v1475_v48 = vpack.c.bf16 %v831_v43, %v830_v28  ;;  %vm669_vm15 = vcmp.gt.f32.partialorder %v429_v37, 0.0  ;;  %v733_v49 = vmul.f32 0.2, %v429_v37  ;;  %v444_v50 = vpop.f32.mrb[11].mxu0  ;;  %v572_v51 = vpop.f32.mrb[11].mxu1 }
  0xf9   :  { %vm701_vm0 = vcmp.gt.f32.partialorder %v557_v38, 0.0  ;;  %1539 = vst [vmem:[%s2057_s3 + $0x18] sm:$0xff] %v1395_v42   ;;  %v765_v52 = vmul.f32 0.2, %v557_v38  ;;  %vm674_vm1 = vcmp.gt.f32.partialorder %v450_v39, 0.0  ;;  %vm706_vm2 = vcmp.gt.f32.partialorder %v578_v44, 0.0 }
  0xfa   :  { %v738_v53 = vmul.f32 0.2, %v450_v39  ;;  %1555 = vst [vmem:[%s2057_s3 + $0x98] sm:$0xff] %v1475_v48   ;;  %v797_v54 = vsel %vm669_vm15, %v429_v37, %v733_v49  ;;  %v770_v55 = vmul.f32 0.2, %v578_v44  ;;  %vm672_vm3 = vcmp.gt.f32.partialorder %v442_v45, 0.0 }
  0xfb   :  { %v736_v56 = vmul.f32 0.2, %v442_v45  ;;  %v1390_v57 = vpack.c.bf16 %v797_v54, %v796_v30  ;;  %v829_v58 = vsel %vm701_vm0, %v557_v38, %v765_v52  ;;  %v570_v60 = vadd.f32 %v1883_v36, %v569_v41 }
  0xfc   :  { %v802_v59 = vsel %vm674_vm1, %v450_v39, %v738_v53  ;;  %v1470_v61 = vpack.c.bf16 %v829_v58, %v828_v31  ;;  %v834_v62 = vsel %vm706_vm2, %v578_v44, %v770_v55  ;;  %v453_v0 = vadd.f32 %v1623_v46, %v1883_v36 }
  0xfd   :  { %v800_v63 = vsel %vm672_vm3, %v442_v45, %v736_v56  ;;  %1538 = vst [vmem:[%s2057_s3 + $0x10] sm:$0xff] %v1390_v57   ;;  %vm704_vm4 = vcmp.gt.f32.partialorder %v570_v60, 0.0  ;;  %v768_v1 = vmul.f32 0.2, %v570_v60  ;;  %v581_v2 = vadd.f32 %v1655_v47, %v1883_v36  ;;  %v1626_v4 = vpop.f32.mrb[12].mxu0  ;;  %v1658_v5 = vpop.f32.mrb[12].mxu1 }
  0xfe   :  { %v445_v3 = vadd.f32 %v1883_v36, %v444_v50  ;;  %1554 = vst [vmem:[%s2057_s3 + $0x90] sm:$0xff] %v1470_v61   ;;  %vm675_vm5 = vcmp.gt.f32.partialorder %v453_v0, 0.0  ;;  %v739_v6 = vmul.f32 0.2, %v453_v0  ;;  %v573_v7 = vadd.f32 %v1883_v36, %v572_v51  ;;  %v457_v9 = vpop.f32.mrb[13].mxu0  ;;  %v585_v10 = vpop.f32.mrb[13].mxu1 }
  0xff   :  { %v466_v8 = vadd.f32 %v1626_v4, %v1883_v36  ;;  %v832_v11 = vsel %vm704_vm4, %v570_v60, %v768_v1  ;;  %vm707_vm6 = vcmp.gt.f32.partialorder %v581_v2, 0.0  ;;  %v771_v12 = vmul.f32 0.2, %v581_v2  ;;  %v1627_v13 = vpop.f32.mrb[14].mxu0  ;;  %v1659_v14 = vpop.f32.mrb[14].mxu1 }
 0x100   :  { %vm673_vm7 = vcmp.gt.f32.partialorder %v445_v3, 0.0  ;;  %v803_v15 = vsel %vm675_vm5, %v453_v0, %v739_v6  ;;  %v737_v16 = vmul.f32 0.2, %v445_v3  ;;  %vm705_vm8 = vcmp.gt.f32.partialorder %v573_v7, 0.0  ;;  %v460_v18 = vpop.f32.mrb[15].mxu0  ;;  %v588_v22 = vpop.f32.mrb[15].mxu1 }
 0x101   :  { %v769_v17 = vmul.f32 0.2, %v573_v7  ;;  %v1405_v19 = vpack.c.bf16 %v803_v15, %v802_v59  ;;  %v835_v20 = vsel %vm707_vm6, %v581_v2, %v771_v12  ;;  %vm678_vm9 = vcmp.gt.f32.partialorder %v466_v8, 0.0 }
 0x102   :  { %v742_v21 = vmul.f32 0.2, %v466_v8  ;;  %v1485_v23 = vpack.c.bf16 %v835_v20, %v834_v62  ;;  %v801_v24 = vsel %vm673_vm7, %v445_v3, %v737_v16  ;;  %v594_v26 = vadd.f32 %v1658_v5, %v1883_v36 }
 0x103   :  { %v833_v25 = vsel %vm705_vm8, %v573_v7, %v769_v17  ;;  %1541 = vst [vmem:[%s2057_s3 + $0x28] sm:$0xff] %v1405_v19   ;;  %v1400_v27 = vpack.c.bf16 %v801_v24, %v800_v63  ;;  %v458_v30 = vadd.f32 %v1883_v36, %v457_v9  ;;  %v586_v32 = vadd.f32 %v1883_v36, %v585_v10 }
 0x104   :  { %v1480_v28 = vpack.c.bf16 %v833_v25, %v832_v11  ;;  %v806_v29 = vsel %vm678_vm9, %v466_v8, %v742_v21  ;;  %1557 = vst [vmem:[%s2057_s3 + $0xa8] sm:$0xff] %v1485_v23   ;;  %vm710_vm10 = vcmp.gt.f32.partialorder %v594_v26, 0.0  ;;  %v774_v31 = vmul.f32 0.2, %v594_v26 }
 0x105   :  { %v469_v33 = vadd.f32 %v1627_v13, %v1883_v36  ;;  %1540 = vst [vmem:[%s2057_s3 + $0x20] sm:$0xff] %v1400_v27   ;;  %vm676_vm11 = vcmp.gt.f32.partialorder %v458_v30, 0.0  ;;  %v740_v34 = vmul.f32 0.2, %v458_v30  ;;  %v597_v35 = vadd.f32 %v1659_v14, %v1883_v36  ;;  %v1630_v38 = vpop.f32.mrb[16].mxu0  ;;  %v1662_v39 = vpop.f32.mrb[16].mxu1 }
 0x106   :  { %1556 = vst [vmem:[%s2057_s3 + $0xa0] sm:$0xff] %v1480_v28   ;;  %v461_v37 = vadd.f32 %v1883_v36, %v460_v18  ;;  %v838_v40 = vsel %vm710_vm10, %v594_v26, %v774_v31  ;;  %vm708_vm12 = vcmp.gt.f32.partialorder %v586_v32, 0.0  ;;  %v772_v41 = vmul.f32 0.2, %v586_v32  ;;  %v473_v42 = vpop.f32.mrb[17].mxu0  ;;  %v601_v43 = vpop.f32.mrb[17].mxu1 }
 0x107   :  { %vm679_vm13 = vcmp.gt.f32.partialorder %v469_v33, 0.0  ;;  %v804_v44 = vsel %vm676_vm11, %v458_v30, %v740_v34  ;;  %v743_v45 = vmul.f32 0.2, %v469_v33  ;;  %vm711_vm14 = vcmp.gt.f32.partialorder %v597_v35, 0.0  ;;  %v1631_v47 = vpop.f32.mrb[18].mxu0  ;;  %v1663_v51 = vpop.f32.mrb[18].mxu1 }
 0x108   :  { %v775_v46 = vmul.f32 0.2, %v597_v35  ;;  %v836_v48 = vsel %vm708_vm12, %v586_v32, %v772_v41  ;;  %vm677_vm15 = vcmp.gt.f32.partialorder %v461_v37, 0.0  ;;  %v741_v49 = vmul.f32 0.2, %v461_v37  ;;  %v476_v52 = vpop.f32.mrb[19].mxu0 }
 0x109   :  { %v589_v50 = vadd.f32 %v1883_v36, %v588_v22  ;;  %v807_v53 = vsel %vm679_vm13, %v469_v33, %v743_v45  ;;  %v482_v55 = vadd.f32 %v1630_v38, %v1883_v36  ;;  %v610_v56 = vadd.f32 %v1662_v39, %v1883_v36  ;;  %v604_v57 = vpop.f32.mrb[19].mxu1 }
 0x10a   :  { %v839_v54 = vsel %vm711_vm14, %v597_v35, %v775_v46  ;;  %v1415_v58 = vpack.c.bf16 %v807_v53, %v806_v29  ;;  %v805_v60 = vsel %vm677_vm15, %v461_v37, %v741_v49  ;;  %v474_v1 = vadd.f32 %v1883_v36, %v473_v42 }
 0x10b   :  { %v1495_v59 = vpack.c.bf16 %v839_v54, %v838_v40  ;;  %vm709_vm0 = vcmp.gt.f32.partialorder %v589_v50, 0.0  ;;  %v1410_v61 = vpack.c.bf16 %v805_v60, %v804_v44  ;;  %v773_v62 = vmul.f32 0.2, %v589_v50 }
 0x10c   :  { %vm682_vm1 = vcmp.gt.f32.partialorder %v482_v55, 0.0  ;;  %v746_v63 = vmul.f32 0.2, %v482_v55  ;;  %1543 = vst [vmem:[%s2057_s3 + $0x38] sm:$0xff] %v1415_v58   ;;  %vm714_vm2 = vcmp.gt.f32.partialorder %v610_v56, 0.0  ;;  %v602_v2 = vadd.f32 %v1883_v36, %v601_v43 }
 0x10d   :  { %1559 = vst [vmem:[%s2057_s3 + $0xb8] sm:$0xff] %v1495_v59   ;;  %v778_v0 = vmul.f32 0.2, %v610_v56  ;;  %1542 = vst [vmem:[%s2057_s3 + $0x30] sm:$0xff] %v1410_v61   ;;  %v837_v3 = vsel %vm709_vm0, %v589_v50, %v773_v62  ;;  %v485_v5 = vadd.f32 %v1631_v47, %v1883_v36  ;;  %v613_v6 = vadd.f32 %v1663_v51, %v1883_v36  ;;  %v1634_v7 = vpop.f32.mrb[20].mxu0  ;;  %v1666_v8 = vpop.f32.mrb[20].mxu1 }
 0x10e   :  { %v810_v4 = vsel %vm682_vm1, %v482_v55, %v746_v63  ;;  %v1490_v9 = vpack.c.bf16 %v837_v3, %v836_v48  ;;  %vm680_vm3 = vcmp.gt.f32.partialorder %v474_v1, 0.0  ;;  %v744_v11 = vmul.f32 0.2, %v474_v1  ;;  %v489_v12 = vpop.f32.mrb[21].mxu0  ;;  %v617_v13 = vpop.f32.mrb[21].mxu1 }
 0x10f   :  { %v842_v10 = vsel %vm714_vm2, %v610_v56, %v778_v0  ;;  %vm712_vm4 = vcmp.gt.f32.partialorder %v602_v2, 0.0  ;;  %v776_v14 = vmul.f32 0.2, %v602_v2  ;;  %vm683_vm5 = vcmp.gt.f32.partialorder %v485_v5, 0.0  ;;  %v1635_v19 = vpop.f32.mrb[22].mxu0  ;;  %v1667_v20 = vpop.f32.mrb[22].mxu1 }
 0x110   :  { %v747_v15 = vmul.f32 0.2, %v485_v5  ;;  %1558 = vst [vmem:[%s2057_s3 + $0xb0] sm:$0xff] %v1490_v9   ;;  %v808_v16 = vsel %vm680_vm3, %v474_v1, %v744_v11  ;;  %vm715_vm6 = vcmp.gt.f32.partialorder %v613_v6, 0.0  ;;  %v779_v17 = vmul.f32 0.2, %v613_v6 }
 0x111   :  { %v477_v18 = vadd.f32 %v1883_v36, %v476_v52  ;;  %v840_v21 = vsel %vm712_vm4, %v602_v2, %v776_v14  ;;  %v605_v23 = vadd.f32 %v1883_v36, %v604_v57  ;;  %v498_v24 = vadd.f32 %v1634_v7, %v1883_v36  ;;  %v492_v25 = vpop.f32.mrb[23].mxu0  ;;  %v620_v26 = vpop.f32.mrb[23].mxu1 }
 0x112   :  { %v811_v22 = vsel %vm683_vm5, %v485_v5, %v747_v15  ;;  %v843_v28 = vsel %vm715_vm6, %v613_v6, %v779_v17  ;;  %v626_v34 = vadd.f32 %v1666_v8, %v1883_v36  ;;  %v490_v35 = vadd.f32 %v1883_v36, %v489_v12 }
 0x113   :  { %v1425_v27 = vpack.c.bf16 %v811_v22, %v810_v4  ;;  %vm681_vm7 = vcmp.gt.f32.partialorder %v477_v18, 0.0  ;;  %v745_v29 = vmul.f32 0.2, %v477_v18  ;;  %v1505_v30 = vpack.c.bf16 %v843_v28, %v842_v10 }
 0x114   :  { %vm713_vm8 = vcmp.gt.f32.partialorder %v605_v23, 0.0  ;;  %v777_v31 = vmul.f32 0.2, %v605_v23  ;;  %vm686_vm9 = vcmp.gt.f32.partialorder %v498_v24, 0.0  ;;  %v750_v33 = vmul.f32 0.2, %v498_v24 }
 0x115   :  { %1545 = vst [vmem:[%s2057_s3 + $0x48] sm:$0xff] %v1425_v27   ;;  %v809_v32 = vsel %vm681_vm7, %v477_v18, %v745_v29  ;;  %1561 = vst [vmem:[%s2057_s3 + $0xc8] sm:$0xff] %v1505_v30   ;;  %v618_v39 = vadd.f32 %v1883_v36, %v617_v13  ;;  %v501_v40 = vadd.f32 %v1635_v19, %v1883_v36  ;;  %v1638_v41 = vpop.f32.mrb[24].mxu0  ;;  %v1670_v42 = vpop.f32.mrb[24].mxu1  ;;  %vm718_vm10 = vcmp.gt.f32.partialorder %v626_v34, 0.0 }
 0x116   :  { %v1420_v37 = vpack.c.bf16 %v809_v32, %v808_v16  ;;  %v841_v38 = vsel %vm713_vm8, %v605_v23, %v777_v31  ;;  %v782_v44 = vmul.f32 0.2, %v626_v34  ;;  %v505_v45 = vpop.f32.mrb[25].mxu0  ;;  %v633_v46 = vpop.f32.mrb[25].mxu1  ;;  %v814_v47 = vsel %vm686_vm9, %v498_v24, %v750_v33 }
 0x117   :  { %v1500_v43 = vpack.c.bf16 %v841_v38, %v840_v21  ;;  %vm684_vm11 = vcmp.gt.f32.partialorder %v490_v35, 0.0  ;;  %v748_v48 = vmul.f32 0.2, %v490_v35  ;;  %v780_v49 = vmul.f32 0.2, %v618_v39  ;;  %v1639_v52 = vpop.f32.mrb[26].mxu0 }
 0x118   :  { %1544 = vst [vmem:[%s2057_s3 + $0x40] sm:$0xff] %v1420_v37   ;;  %vm716_vm12 = vcmp.gt.f32.partialorder %v618_v39, 0.0  ;;  %vm687_vm13 = vcmp.gt.f32.partialorder %v501_v40, 0.0  ;;  %v751_v50 = vmul.f32 0.2, %v501_v40  ;;  %v629_v51 = vadd.f32 %v1667_v20, %v1883_v36  ;;  %v1671_v53 = vpop.f32.mrb[26].mxu1 }
 0x119   :  { %1560 = vst [vmem:[%s2057_s3 + $0xc0] sm:$0xff] %v1500_v43   ;;  %v846_v54 = vsel %vm718_vm10, %v626_v34, %v782_v44  ;;  %v812_v55 = vsel %vm684_vm11, %v490_v35, %v748_v48  ;;  %v493_v56 = vadd.f32 %v1883_v36, %v492_v25  ;;  %v621_v57 = vadd.f32 %v1883_v36, %v620_v26  ;;  %v508_v58 = vpop.f32.mrb[27].mxu0  ;;  %v636_v59 = vpop.f32.mrb[27].mxu1 }
 0x11a   :  { %v815_v60 = vsel %vm687_vm13, %v501_v40, %v751_v50  ;;  %vm719_vm14 = vcmp.gt.f32.partialorder %v629_v51, 0.0  ;;  %v783_v61 = vmul.f32 0.2, %v629_v51  ;;  %v514_v62 = vadd.f32 %v1638_v41, %v1883_v36 }
 0x11b   :  { %v1435_v63 = vpack.c.bf16 %v815_v60, %v814_v47  ;;  %vm685_vm15 = vcmp.gt.f32.partialorder %v493_v56, 0.0  ;;  %v749_v0 = vmul.f32 0.2, %v493_v56  ;;  %vm717_vm0 = vcmp.gt.f32.partialorder %v621_v57, 0.0 }
 0x11c   :  { %v847_v1 = vsel %vm719_vm14, %v629_v51, %v783_v61  ;;  %v781_v2 = vmul.f32 0.2, %v621_v57  ;;  %vm690_vm1 = vcmp.gt.f32.partialorder %v514_v62, 0.0  ;;  %v754_v3 = vmul.f32 0.2, %v514_v62 }
 0x11d   :  { %1547 = vst [vmem:[%s2057_s3 + $0x58] sm:$0xff] %v1435_v63   ;;  %v1515_v4 = vpack.c.bf16 %v847_v1, %v846_v54  ;;  %v813_v5 = vsel %vm685_vm15, %v493_v56, %v749_v0  ;;  %v642_v6 = vadd.f32 %v1670_v42, %v1883_v36  ;;  %v506_v7 = vadd.f32 %v1883_v36, %v505_v45  ;;  %v1642_v8 = vpop.f32.mrb[28].mxu0  ;;  %v1674_v9 = vpop.f32.mrb[28].mxu1 }
 0x11e   :  { %v844_v10 = vsel %vm716_vm12, %v618_v39, %v780_v49  ;;  %v1430_v11 = vpack.c.bf16 %v813_v5, %v812_v55  ;;  %v845_v12 = vsel %vm717_vm0, %v621_v57, %v781_v2  ;;  %v634_v13 = vadd.f32 %v1883_v36, %v633_v46  ;;  %v521_v14 = vpop.f32.mrb[29].mxu0  ;;  %v649_v15 = vpop.f32.mrb[29].mxu1 }
 0x11f   :  { %1563 = vst [vmem:[%s2057_s3 + $0xd8] sm:$0xff] %v1515_v4   ;;  %v1510_v16 = vpack.c.bf16 %v845_v12, %v844_v10  ;;  %vm722_vm2 = vcmp.gt.f32.partialorder %v642_v6, 0.0  ;;  %v786_v17 = vmul.f32 0.2, %v642_v6  ;;  %vm688_vm3 = vcmp.gt.f32.partialorder %v506_v7, 0.0  ;;  %v1643_v18 = vpop.f32.mrb[30].mxu0 }
 0x120   :  { %v1675_v19 = vpop.f32.mrb[30].mxu1  ;;  %1546 = vst [vmem:[%s2057_s3 + $0x50] sm:$0xff] %v1430_v11   ;;  %v818_v20 = vsel %vm690_vm1, %v514_v62, %v754_v3  ;;  %v752_v21 = vmul.f32 0.2, %v506_v7  ;;  %vm720_vm4 = vcmp.gt.f32.partialorder %v634_v13, 0.0  ;;  %v517_v22 = vadd.f32 %v1639_v52, %v1883_v36  ;;  %v524_v23 = vpop.f32.mrb[31].mxu0 }
 0x121   :  { %1562 = vst [vmem:[%s2057_s3 + $0xd0] sm:$0xff] %v1510_v16   ;;  %v784_v24 = vmul.f32 0.2, %v634_v13  ;;  %v645_v25 = vadd.f32 %v1671_v53, %v1883_v36  ;;  %v509_v26 = vadd.f32 %v1883_v36, %v508_v58  ;;  %v637_v27 = vadd.f32 %v1883_v36, %v636_v59  ;;  %v652_v28 = vpop.f32.mrb[31].mxu1 }
 0x122   :  { %v850_v29 = vsel %vm722_vm2, %v642_v6, %v786_v17  ;;  %v816_v30 = vsel %vm688_vm3, %v506_v7, %v752_v21  ;;  %vm691_vm5 = vcmp.gt.f32.partialorder %v517_v22, 0.0  ;;  %v755_v31 = vmul.f32 0.2, %v517_v22 }
 0x123   :  { %vm723_vm6 = vcmp.gt.f32.partialorder %v645_v25, 0.0  ;;  %v787_v32 = vmul.f32 0.2, %v645_v25  ;;  %vm689_vm7 = vcmp.gt.f32.partialorder %v509_v26, 0.0  ;;  %v753_v33 = vmul.f32 0.2, %v509_v26 }
 0x124   :  { %v819_v34 = vsel %vm691_vm5, %v517_v22, %v755_v31  ;;  %vm721_vm8 = vcmp.gt.f32.partialorder %v637_v27, 0.0  ;;  %v785_v35 = vmul.f32 0.2, %v637_v27  ;;  %v530_v37 = vadd.f32 %v1642_v8, %v1883_v36 }
 0x125   :  { %v1445_v38 = vpack.c.bf16 %v819_v34, %v818_v20  ;;  %v851_v39 = vsel %vm723_vm6, %v645_v25, %v787_v32  ;;  %v817_v40 = vsel %vm689_vm7, %v509_v26, %v753_v33  ;;  %v658_v41 = vadd.f32 %v1674_v9, %v1883_v36 }
 0x126   :  { %v848_v42 = vsel %vm720_vm4, %v634_v13, %v784_v24  ;;  %v1525_v43 = vpack.c.bf16 %v851_v39, %v850_v29  ;;  %v1440_v44 = vpack.c.bf16 %v817_v40, %v816_v30  ;;  %v849_v45 = vsel %vm721_vm8, %v637_v27, %v785_v35 }
 0x127   :  { %1549 = vst [vmem:[%s2057_s3 + $0x68] sm:$0xff] %v1445_v38   ;;  %v1520_v46 = vpack.c.bf16 %v849_v45, %v848_v42  ;;  %vm694_vm9 = vcmp.gt.f32.partialorder %v530_v37, 0.0  ;;  %v758_v47 = vmul.f32 0.2, %v530_v37  ;;  %v790_v48 = vmul.f32 0.2, %v658_v41 }
 0x128   :  { %1565 = vst [vmem:[%s2057_s3 + $0xe8] sm:$0xff] %v1525_v43   ;;  %1548 = vst [vmem:[%s2057_s3 + $0x60] sm:$0xff] %v1440_v44   ;;  %v522_v49 = vadd.f32 %v1883_v36, %v521_v14  ;;  %v650_v50 = vadd.f32 %v1883_v36, %v649_v15  ;;  %v533_v51 = vadd.f32 %v1643_v18, %v1883_v36  ;;  %vm726_vm10 = vcmp.gt.f32.partialorder %v658_v41, 0.0 }
 0x129   :  { %v661_v52 = vadd.f32 %v1675_v19, %v1883_v36  ;;  %1564 = vst [vmem:[%s2057_s3 + $0xe0] sm:$0xff] %v1520_v46   ;;  %v525_v53 = vadd.f32 %v1883_v36, %v524_v23  ;;  %v653_v54 = vadd.f32 %v1883_v36, %v652_v28  ;;  %v822_v55 = vsel %vm694_vm9, %v530_v37, %v758_v47 }
 0x12a   :  { %vm692_vm11 = vcmp.gt.f32.partialorder %v522_v49, 0.0  ;;  %v756_v56 = vmul.f32 0.2, %v522_v49  ;;  %v788_v57 = vmul.f32 0.2, %v650_v50  ;;  %vm695_vm12 = vcmp.gt.f32.partialorder %v533_v51, 0.0 }
 0x12b   :  { %v759_v58 = vmul.f32 0.2, %v533_v51  ;;  %vm727_vm13 = vcmp.gt.f32.partialorder %v661_v52, 0.0  ;;  %v791_v59 = vmul.f32 0.2, %v661_v52  ;;  %v854_v60 = vsel %vm726_vm10, %v658_v41, %v790_v48 }
 0x12c   :  { %vm724_vm14 = vcmp.gt.f32.partialorder %v650_v50, 0.0  ;;  %vm693_vm15 = vcmp.gt.f32.partialorder %v525_v53, 0.0  ;;  %v757_v61 = vmul.f32 0.2, %v525_v53  ;;  %vm725_vm0 = vcmp.gt.f32.partialorder %v653_v54, 0.0 }
 0x12d   :  { %v823_v62 = vsel %vm695_vm12, %v533_v51, %v759_v58  ;;  %v855_v63 = vsel %vm727_vm13, %v661_v52, %v791_v59  ;;  %v789_v0 = vmul.f32 0.2, %v653_v54  ;;  %v820_v1 = vsel %vm692_vm11, %v522_v49, %v756_v56 }
 0x12e   :  { %v1455_v2 = vpack.c.bf16 %v823_v62, %v822_v55  ;;  %v1535_v3 = vpack.c.bf16 %v855_v63, %v854_v60  ;;  %v821_v36 = vsel %vm693_vm15, %v525_v53, %v757_v61  ;;  %v852_v4 = vsel %vm724_vm14, %v650_v50, %v788_v57 }
 0x12f   :  { %v1450_v5 = vpack.c.bf16 %v821_v36, %v820_v1  ;;  %v853_v6 = vsel %vm725_vm0, %v653_v54, %v789_v0 }
 0x130   :  { %1551 = vst [vmem:[%s2057_s3 + $0x78] sm:$0xff] %v1455_v2   ;;  %1567 = vst [vmem:[%s2057_s3 + $0xf8] sm:$0xff] %v1535_v3   ;;  %v1530_v7 = vpack.c.bf16 %v853_v6, %v852_v4 }
 0x131   :  { %1550 = vst [vmem:[%s2057_s3 + $0x70] sm:$0xff] %v1450_v5  }
 0x132   :  { %1566 = vst [vmem:[%s2057_s3 + $0xf0] sm:$0xff] %v1530_v7  }

// kernel: _lambda_.9
= control target key start
LH: loop header
LB: loop body
LE: loop exit
PB: predicated region body
PF: predicated region fallthrough
CT: control target
= control target key end

     0   :  { %vm330_vm0 = vcmask 1040384   ;;  %s561_s1 = inlined_call_operand.vmem [shape: bf16[128,128], index: 1, kind: input, shape index: {}]   ;;  %s562_s0 = inlined_call_operand.vmem [shape: bf16[128,128], index: 0, kind: input, shape index: {}]   ;;  %s563_s2 = inlined_call_operand.vmem [shape: f32[128,128], index: 2, kind: output, shape index: {0}]   ;;  %s564_s3 = inlined_call_operand.vmem [shape: f32[1,2,128], index: 3, kind: output, shape index: {1}]  }
   0x1   :  { %v421_v0 = vld [vmem:[%s561_s1] sm:$0xff]   ;;  %v422_v1 = vld [vmem:[%s561_s1 + $0x8] sm:$0xff]   ;;  %v423_v2 = vld [vmem:[%s561_s1 + $0x10] sm:$0xff]  }
   0x2   :  { %373 = vmatprep.subr.bf16.mxu0 %v421_v0  ;;  %405 = vmatprep.subr.bf16.mxu1 %v421_v0  ;;  %v424_v3 = vld [vmem:[%s561_s1 + $0x18] sm:$0xff]   ;;  %v429_v4 = vld [vmem:[%s562_s0] sm:$0xff]   ;;  %v426_v7 = vld [vmem:[%s561_s1 + $0x28] sm:$0xff]  }
   0x3   :  { %374 = vmatpush3.bf16.msra.mxu0 %v421_v0  ;;  %413 = vmatpush3.bf16.msra.mxu1 %v421_v0  ;;  %v425_v5 = vld [vmem:[%s561_s1 + $0x20] sm:$0xff]   ;;  %v427_v8 = vld [vmem:[%s561_s1 + $0x30] sm:$0xff]   ;;  %v428_v9 = vld [vmem:[%s561_s1 + $0x38] sm:$0xff]  }
   0x4   :  { %375 = vmatprep.subr.bf16.mxu0 %v422_v1  ;;  %406 = vmatprep.subr.bf16.mxu1 %v422_v1  ;;  %v433_v6 = vld [vmem:[%s562_s0 + $0x20] sm:$0xff]   ;;  %v430_v10 = vld [vmem:[%s562_s0 + $0x8] sm:$0xff]   ;;  %v431_v12 = vld [vmem:[%s562_s0 + $0x10] sm:$0xff]  }
   0x5   :  { %389 = vmatprep.mubr.bf16.mxu0 %v429_v4  ;;  %397 = vmatprep.mubr.bf16.mxu1 %v433_v6  ;;  %v434_v11 = vld [vmem:[%s562_s0 + $0x28] sm:$0xff]   ;;  %v435_v13 = vld [vmem:[%s562_s0 + $0x30] sm:$0xff]   ;;  %v432_v14 = vld [vmem:[%s562_s0 + $0x18] sm:$0xff]  }
   0x6   :  { %v436_v15 = vld [vmem:[%s562_s0 + $0x38] sm:$0xff]  }
   0x7   :  { %376 = vmatpush3.bf16.msra.mxu0 %v422_v1  ;;  %414 = vmatpush3.bf16.msra.mxu1 %v422_v1 }
   0x8   :  { %377 = vmatprep.subr.bf16.mxu0 %v423_v2  ;;  %407 = vmatprep.subr.bf16.mxu1 %v423_v2 }
   0xb   :  { %378 = vmatpush3.bf16.msra.mxu0 %v423_v2  ;;  %415 = vmatpush3.bf16.msra.mxu1 %v423_v2 }
   0xc   :  { %379 = vmatprep.subr.bf16.mxu0 %v424_v3  ;;  %408 = vmatprep.subr.bf16.mxu1 %v424_v3 }
   0xf   :  { %380 = vmatpush3.bf16.msra.mxu0 %v424_v3  ;;  %416 = vmatpush3.bf16.msra.mxu1 %v424_v3 }
  0x10   :  { %381 = vmatprep.subr.bf16.mxu0 %v425_v5  ;;  %409 = vmatprep.subr.bf16.mxu1 %v425_v5 }
  0x13   :  { %382 = vmatpush3.bf16.msra.mxu0 %v425_v5  ;;  %417 = vmatpush3.bf16.msra.mxu1 %v425_v5 }
  0x14   :  { %383 = vmatprep.subr.bf16.mxu0 %v426_v7  ;;  %410 = vmatprep.subr.bf16.mxu1 %v426_v7 }
  0x17   :  { %384 = vmatpush3.bf16.msra.mxu0 %v426_v7  ;;  %418 = vmatpush3.bf16.msra.mxu1 %v426_v7 }
  0x18   :  { %385 = vmatprep.subr.bf16.mxu0 %v427_v8  ;;  %411 = vmatprep.subr.bf16.mxu1 %v427_v8 }
  0x1b   :  { %386 = vmatpush3.bf16.msra.mxu0 %v427_v8  ;;  %419 = vmatpush3.bf16.msra.mxu1 %v427_v8 }
  0x1c   :  { %387 = vmatprep.subr.bf16.mxu0 %v428_v9  ;;  %412 = vmatprep.subr.bf16.mxu1 %v428_v9 }
  0x1f   :  { %388 = vmatpush3.bf16.msra.mxu0 %v428_v9  ;;  %420 = vmatpush3.bf16.msra.mxu1 %v428_v9 }
  0x22   :  { %390 = vmatmul.mubr.bf16.vlgmr.msra.gmra.mrb[0].mxu0 %v430_v10  ;;  %398 = vmatmul.mubr.bf16.vlgmr.msra.gmra.mrb[0].mxu1 %v434_v11 }
  0x23   :  { %393 = vmatprep.mubr.bf16.mxu0 %v431_v12  ;;  %401 = vmatprep.mubr.bf16.mxu1 %v435_v13 }
  0x2a   :  { %394 = vmatmul.mubr.bf16.gmra.mrb[4].mxu0 %v432_v14  ;;  %402 = vmatmul.mubr.bf16.gmra.mrb[4].mxu1 %v436_v15 }
  0xf5   :  { %v391_v16 = vpop.f32.mrb[0].mxu0  ;;  %v505_v17 = vpop.f32.mrb[0].mxu1 }
  0xf6   :  { %241 = vst [vmem:[%s563_s2 + $0x10] sm:$0xff] %v391_v16  ;;  %v176_v18 = vpop.f32.mrb[1].mxu0  ;;  %249 = vst [vmem:[%s563_s2 + $0x50] sm:$0xff] %v505_v17  ;;  %v208_v19 = vpop.f32.mrb[1].mxu1 }
  0xf7   :  { %239 = vst [vmem:[%s563_s2] sm:$0xff] %v176_v18  ;;  %v392_v20 = vpop.f32.mrb[2].mxu0  ;;  %247 = vst [vmem:[%s563_s2 + $0x40] sm:$0xff] %v208_v19  ;;  %v400_v21 = vpop.f32.mrb[2].mxu1 }
  0xf8   :  { %242 = vst [vmem:[%s563_s2 + $0x18] sm:$0xff] %v392_v20  ;;  %v179_v22 = vpop.f32.mrb[3].mxu0  ;;  %250 = vst [vmem:[%s563_s2 + $0x58] sm:$0xff] %v400_v21  ;;  %v211_v23 = vpop.f32.mrb[3].mxu1 }
  0xf9   :  { %240 = vst [vmem:[%s563_s2 + $0x8] sm:$0xff] %v179_v22  ;;  %v255_v24 = vadd.f32 %v179_v22, %v176_v18  ;;  %248 = vst [vmem:[%s563_s2 + $0x48] sm:$0xff] %v211_v23 }
  0xfb   :  { %v256_v25 = vadd.f32 %v391_v16, %v255_v24 }
  0xfd   :  { %v395_v26 = vpop.f32.mrb[4].mxu0  ;;  %v257_v27 = vadd.f32 %v392_v20, %v256_v25  ;;  %v403_v28 = vpop.f32.mrb[4].mxu1 }
  0xfe   :  { %245 = vst [vmem:[%s563_s2 + $0x30] sm:$0xff] %v395_v26  ;;  %v192_v29 = vpop.f32.mrb[5].mxu0  ;;  %253 = vst [vmem:[%s563_s2 + $0x70] sm:$0xff] %v403_v28  ;;  %v224_v30 = vpop.f32.mrb[5].mxu1 }
  0xff   :  { %243 = vst [vmem:[%s563_s2 + $0x20] sm:$0xff] %v192_v29  ;;  %v258_v31 = vadd.f32 %v257_v27, %v192_v29  ;;  %v396_v32 = vpop.f32.mrb[6].mxu0  ;;  %251 = vst [vmem:[%s563_s2 + $0x60] sm:$0xff] %v224_v30  ;;  %v404_v33 = vpop.f32.mrb[6].mxu1 }
 0x100   :  { %246 = vst [vmem:[%s563_s2 + $0x38] sm:$0xff] %v396_v32  ;;  %v195_v34 = vpop.f32.mrb[7].mxu0  ;;  %254 = vst [vmem:[%s563_s2 + $0x78] sm:$0xff] %v404_v33  ;;  %v227_v35 = vpop.f32.mrb[7].mxu1 }
 0x101   :  { %244 = vst [vmem:[%s563_s2 + $0x28] sm:$0xff] %v195_v34  ;;  %v259_v36 = vadd.f32 %v258_v31, %v195_v34  ;;  %252 = vst [vmem:[%s563_s2 + $0x68] sm:$0xff] %v227_v35 }
 0x103   :  { %v260_v37 = vadd.f32 %v395_v26, %v259_v36 }
 0x105   :  { %v261_v38 = vadd.f32 %v396_v32, %v260_v37 }
 0x107   :  { %v262_v39 = vadd.f32 %v261_v38, %v208_v19 }
 0x109   :  { %v263_v40 = vadd.f32 %v262_v39, %v211_v23 }
 0x10b   :  { %v264_v41 = vadd.f32 %v505_v17, %v263_v40 }
 0x10d   :  { %v265_v42 = vadd.f32 %v400_v21, %v264_v41 }
 0x10f   :  { %v266_v43 = vadd.f32 %v265_v42, %v224_v30 }
 0x111   :  { %v267_v44 = vadd.f32 %v266_v43, %v227_v35 }
 0x113   :  { %v268_v45 = vadd.f32 %v403_v28, %v267_v44 }
 0x115   :  { %v269_v46 = vadd.f32 %v404_v33, %v268_v45 }
 0x117   :  { %v270_v47 = vrot.slane %v269_v46, 4 }
 0x119   :  { %v271_v48 = vadd.f32 %v270_v47, %v269_v46 }
 0x11b   :  { %v272_v49 = vrot.slane %v271_v48, 2 }
 0x11d   :  { %v273_v50 = vadd.f32 %v272_v49, %v271_v48 }
 0x11f   :  { %v274_v51 = vrot.slane %v273_v50, 1 }
 0x121   :  { %v275_v52 = vadd.f32 %v274_v51, %v273_v50 }
 0x123   :  { %v276_v53 = vmul.f32 0.0078125, %v275_v52 }
 0x125   :  { %v277_v54 = vsub.f32 %v176_v18, %v276_v53  ;;  %v278_v55 = vsub.f32 %v179_v22, %v276_v53  ;;  %v279_v56 = vsub.f32 %v391_v16, %v276_v53  ;;  %v280_v57 = vsub.f32 %v392_v20, %v276_v53 }
 0x126   :  { %v281_v58 = vsub.f32 %v192_v29, %v276_v53  ;;  %v282_v59 = vsub.f32 %v195_v34, %v276_v53  ;;  %v283_v60 = vsub.f32 %v395_v26, %v276_v53  ;;  %v284_v61 = vsub.f32 %v396_v32, %v276_v53 }
 0x127   :  { %v285_v62 = vsub.f32 %v208_v19, %v276_v53  ;;  %v286_v63 = vsub.f32 %v211_v23, %v276_v53  ;;  %v287_v0 = vsub.f32 %v505_v17, %v276_v53  ;;  %v288_v1 = vsub.f32 %v400_v21, %v276_v53 }
 0x128   :  { %v289_v2 = vsub.f32 %v224_v30, %v276_v53  ;;  %v290_v3 = vsub.f32 %v227_v35, %v276_v53  ;;  %v291_v4 = vsub.f32 %v403_v28, %v276_v53  ;;  %v292_v5 = vsub.f32 %v404_v33, %v276_v53 }
 0x129   :  { %v293_v6 = vmul.f32 %v277_v54, %v277_v54  ;;  %v294_v7 = vmul.f32 %v278_v55, %v278_v55  ;;  %v295_v8 = vmul.f32 %v279_v56, %v279_v56  ;;  %v296_v10 = vmul.f32 %v280_v57, %v280_v57 }
 0x12a   :  { %v297_v12 = vmul.f32 %v281_v58, %v281_v58  ;;  %v298_v14 = vmul.f32 %v282_v59, %v282_v59  ;;  %v299_v16 = vmul.f32 %v283_v60, %v283_v60  ;;  %v300_v19 = vmul.f32 %v284_v61, %v284_v61 }
 0x12b   :  { %v309_v9 = vadd.f32 %v294_v7, %v293_v6  ;;  %v301_v17 = vmul.f32 %v285_v62, %v285_v62  ;;  %v302_v22 = vmul.f32 %v286_v63, %v286_v63  ;;  %v303_v24 = vmul.f32 %v287_v0, %v287_v0 }
 0x12c   :  { %v304_v26 = vmul.f32 %v288_v1, %v288_v1  ;;  %v305_v28 = vmul.f32 %v289_v2, %v289_v2  ;;  %v306_v30 = vmul.f32 %v290_v3, %v290_v3  ;;  %v307_v32 = vmul.f32 %v291_v4, %v291_v4 }
 0x12d   :  { %v310_v11 = vadd.f32 %v309_v9, %v295_v8  ;;  %v308_v34 = vmul.f32 %v292_v5, %v292_v5 }
 0x12f   :  { %v311_v13 = vadd.f32 %v310_v11, %v296_v10 }
 0x131   :  { %v312_v15 = vadd.f32 %v311_v13, %v297_v12 }
 0x133   :  { %v313_v18 = vadd.f32 %v312_v15, %v298_v14 }
 0x135   :  { %v314_v20 = vadd.f32 %v313_v18, %v299_v16 }
 0x137   :  { %v315_v21 = vadd.f32 %v314_v20, %v300_v19 }
 0x139   :  { %v316_v23 = vadd.f32 %v315_v21, %v301_v17 }
 0x13b   :  { %v317_v25 = vadd.f32 %v316_v23, %v302_v22 }
 0x13d   :  { %v318_v27 = vadd.f32 %v317_v25, %v303_v24 }
 0x13f   :  { %v319_v29 = vadd.f32 %v318_v27, %v304_v26 }
 0x141   :  { %v320_v31 = vadd.f32 %v319_v29, %v305_v28 }
 0x143   :  { %v321_v33 = vadd.f32 %v320_v31, %v306_v30 }
 0x145   :  { %v322_v35 = vadd.f32 %v321_v33, %v307_v32 }
 0x147   :  { %v323_v36 = vadd.f32 %v322_v35, %v308_v34 }
 0x149   :  { %v324_v37 = vrot.slane %v323_v36, 4 }
 0x14b   :  { %v325_v38 = vadd.f32 %v324_v37, %v323_v36 }
 0x14d   :  { %v326_v39 = vrot.slane %v325_v38, 2 }
 0x14f   :  { %v327_v40 = vadd.f32 %v326_v39, %v325_v38 }
 0x151   :  { %v328_v41 = vrot.slane %v327_v40, 1 }
 0x153   :  { %v329_v42 = vadd.f32 %v328_v41, %v327_v40 }
 0x155   :  { %v331_v43 = vsel %vm330_vm0, %v275_v52, %v329_v42 }
 0x156   :  { %332 = vst [vmem:[%s564_s3] sm:$0x3] %v331_v43 }

// kernel: _lambda_.10
= control target key start
LH: loop header
LB: loop body
LE: loop exit
PB: predicated region body
PF: predicated region fallthrough
CT: control target
= control target key end

     0   :  { %s423_s0 = inlined_call_operand.vmem [shape: f32[128,128], index: 0, kind: input, shape index: {}]   ;;  %s424_s1 = inlined_call_operand.vmem [shape: f32[1,128], index: 1, kind: input, shape index: {}]   ;;  %s425_s2 = inlined_call_operand.vmem [shape: f32[1,128], index: 2, kind: input, shape index: {}]   ;;  %s426_s3 = inlined_call_operand.vmem [shape: bf16[128,128], index: 3, kind: output, shape index: {}]  }
   0x1   :  { %v14_v0 = vld [vmem:[%s423_s0] sm:$0xff]  ;;  %v15_v1 = vld [vmem:[%s423_s0 + $0x8] sm:$0xff]  ;;  %v16_v6 = vld [vmem:[%s423_s0 + $0x10] sm:$0xff] }
   0x2   :  { %v318_v2 = vld [vmem:[%s424_s1] ss:$0 sm:$0xff]  ;;  %v17_v7 = vld [vmem:[%s423_s0 + $0x18] sm:$0xff]  ;;  %v19_v11 = vld [vmem:[%s423_s0 + $0x28] sm:$0xff] }
   0x3   :  { %v37_v3 = vmul.f32 %v318_v2, %v14_v0  ;;  %v38_v4 = vmul.f32 %v318_v2, %v15_v1  ;;  %v325_v5 = vld [vmem:[%s425_s2] ss:$0 sm:$0xff]  ;;  %v39_v8 = vmul.f32 %v318_v2, %v16_v6  ;;  %v40_v9 = vmul.f32 %v318_v2, %v17_v7  ;;  %v20_v12 = vld [vmem:[%s423_s0 + $0x30] sm:$0xff]  ;;  %v21_v17 = vld [vmem:[%s423_s0 + $0x38] sm:$0xff] }
   0x4   :  { %v18_v10 = vld [vmem:[%s423_s0 + $0x20] sm:$0xff]  ;;  %v42_v16 = vmul.f32 %v318_v2, %v19_v11  ;;  %v43_v20 = vmul.f32 %v318_v2, %v20_v12  ;;  %v44_v21 = vmul.f32 %v318_v2, %v21_v17  ;;  %v23_v35 = vld [vmem:[%s423_s0 + $0x48] sm:$0xff]  ;;  %v24_v36 = vld [vmem:[%s423_s0 + $0x50] sm:$0xff] }
   0x5   :  { %v60_v13 = vadd.f32 %v325_v5, %v37_v3  ;;  %v61_v14 = vadd.f32 %v325_v5, %v38_v4  ;;  %v41_v15 = vmul.f32 %v318_v2, %v18_v10  ;;  %v62_v18 = vadd.f32 %v325_v5, %v39_v8  ;;  %v22_v34 = vld [vmem:[%s423_s0 + $0x40] sm:$0xff]  ;;  %v25_v42 = vld [vmem:[%s423_s0 + $0x58] sm:$0xff]  ;;  %v27_v48 = vld [vmem:[%s423_s0 + $0x68] sm:$0xff] }
   0x6   :  { %v63_v19 = vadd.f32 %v325_v5, %v40_v9  ;;  %v65_v29 = vadd.f32 %v325_v5, %v42_v16  ;;  %v66_v33 = vadd.f32 %v325_v5, %v43_v20  ;;  %v67_v40 = vadd.f32 %v325_v5, %v44_v21  ;;  %v26_v47 = vld [vmem:[%s423_s0 + $0x60] sm:$0xff]  ;;  %v28_v60 = vld [vmem:[%s423_s0 + $0x70] sm:$0xff]  ;;  %v29_v7 = vld [vmem:[%s423_s0 + $0x78] sm:$0xff] }
   0x7   :  { %vm76_vm0 = vcmp.gt.f32.partialorder %v60_v13, 0.0  ;;  %vm77_vm1 = vcmp.gt.f32.partialorder %v61_v14, 0.0  ;;  %v92_v22 = vmul.f32 0.2, %v60_v13  ;;  %v93_v23 = vmul.f32 0.2, %v61_v14 }
   0x8   :  { %vm78_vm2 = vcmp.gt.f32.partialorder %v62_v18, 0.0  ;;  %vm79_vm3 = vcmp.gt.f32.partialorder %v63_v19, 0.0  ;;  %v94_v24 = vmul.f32 0.2, %v62_v18  ;;  %v95_v25 = vmul.f32 0.2, %v63_v19 }
   0x9   :  { %v108_v26 = vsel %vm76_vm0, %v60_v13, %v92_v22  ;;  %v109_v27 = vsel %vm77_vm1, %v61_v14, %v93_v23  ;;  %v64_v28 = vadd.f32 %v325_v5, %v41_v15  ;;  %vm81_vm5 = vcmp.gt.f32.partialorder %v65_v29, 0.0 }
   0xa   :  { %v245_v30 = vpack.c.bf16 %v109_v27, %v108_v26  ;;  %v110_v31 = vsel %vm78_vm2, %v62_v18, %v94_v24  ;;  %v111_v32 = vsel %vm79_vm3, %v63_v19, %v95_v25  ;;  %v97_v39 = vmul.f32 0.2, %v65_v29 }
   0xb   :  { %v250_v37 = vpack.c.bf16 %v111_v32, %v110_v31  ;;  %vm80_vm4 = vcmp.gt.f32.partialorder %v64_v28, 0.0  ;;  %v96_v38 = vmul.f32 0.2, %v64_v28  ;;  %vm82_vm6 = vcmp.gt.f32.partialorder %v66_v33, 0.0 }
   0xc   :  { %246 = vst [vmem:[%s426_s3] sm:$0xff] %v245_v30   ;;  %v98_v41 = vmul.f32 0.2, %v66_v33  ;;  %v45_v44 = vmul.f32 %v318_v2, %v22_v34  ;;  %v46_v45 = vmul.f32 %v318_v2, %v23_v35  ;;  %v47_v46 = vmul.f32 %v318_v2, %v24_v36 }
   0xd   :  { %282 = vst [vmem:[%s426_s3 + $0x8] sm:$0xff] %v250_v37   ;;  %v112_v43 = vsel %vm80_vm4, %v64_v28, %v96_v38  ;;  %v113_v49 = vsel %vm81_vm5, %v65_v29, %v97_v39  ;;  %vm83_vm7 = vcmp.gt.f32.partialorder %v67_v40, 0.0  ;;  %v99_v50 = vmul.f32 0.2, %v67_v40 }
   0xe   :  { %v114_v51 = vsel %vm82_vm6, %v66_v33, %v98_v41  ;;  %v255_v52 = vpack.c.bf16 %v113_v49, %v112_v43  ;;  %v68_v53 = vadd.f32 %v325_v5, %v45_v44  ;;  %v69_v54 = vadd.f32 %v325_v5, %v46_v45 }
   0xf   :  { %v48_v55 = vmul.f32 %v318_v2, %v25_v42  ;;  %v115_v56 = vsel %vm83_vm7, %v67_v40, %v99_v50  ;;  %v70_v57 = vadd.f32 %v325_v5, %v47_v46  ;;  %v49_v58 = vmul.f32 %v318_v2, %v26_v47 }
  0x10   :  { %v50_v59 = vmul.f32 %v318_v2, %v27_v48  ;;  %283 = vst [vmem:[%s426_s3 + $0x10] sm:$0xff] %v255_v52   ;;  %v260_v61 = vpack.c.bf16 %v115_v56, %v114_v51  ;;  %vm84_vm8 = vcmp.gt.f32.partialorder %v68_v53, 0.0  ;;  %vm85_vm9 = vcmp.gt.f32.partialorder %v69_v54, 0.0 }
  0x11   :  { %v100_v62 = vmul.f32 0.2, %v68_v53  ;;  %v101_v63 = vmul.f32 0.2, %v69_v54  ;;  %v71_v0 = vadd.f32 %v325_v5, %v48_v55  ;;  %vm86_vm10 = vcmp.gt.f32.partialorder %v70_v57, 0.0 }
  0x12   :  { %v102_v1 = vmul.f32 0.2, %v70_v57  ;;  %284 = vst [vmem:[%s426_s3 + $0x18] sm:$0xff] %v260_v61   ;;  %v72_v4 = vadd.f32 %v325_v5, %v49_v58  ;;  %v73_v6 = vadd.f32 %v325_v5, %v50_v59  ;;  %v51_v8 = vmul.f32 %v318_v2, %v28_v60 }
  0x13   :  { %v116_v3 = vsel %vm84_vm8, %v68_v53, %v100_v62  ;;  %v117_v9 = vsel %vm85_vm9, %v69_v54, %v101_v63  ;;  %vm87_vm11 = vcmp.gt.f32.partialorder %v71_v0, 0.0  ;;  %v103_v10 = vmul.f32 0.2, %v71_v0 }
  0x14   :  { %v118_v11 = vsel %vm86_vm10, %v70_v57, %v102_v1  ;;  %v265_v12 = vpack.c.bf16 %v117_v9, %v116_v3  ;;  %vm88_vm12 = vcmp.gt.f32.partialorder %v72_v4, 0.0  ;;  %vm89_vm13 = vcmp.gt.f32.partialorder %v73_v6, 0.0 }
  0x15   :  { %v104_v13 = vmul.f32 0.2, %v72_v4  ;;  %v119_v14 = vsel %vm87_vm11, %v71_v0, %v103_v10  ;;  %v105_v15 = vmul.f32 0.2, %v73_v6  ;;  %v52_v16 = vmul.f32 %v318_v2, %v29_v7 }
  0x16   :  { %v74_v17 = vadd.f32 %v325_v5, %v51_v8  ;;  %285 = vst [vmem:[%s426_s3 + $0x20] sm:$0xff] %v265_v12   ;;  %v270_v18 = vpack.c.bf16 %v119_v14, %v118_v11 }
  0x17   :  { %v120_v19 = vsel %vm88_vm12, %v72_v4, %v104_v13  ;;  %v121_v20 = vsel %vm89_vm13, %v73_v6, %v105_v15  ;;  %v75_v21 = vadd.f32 %v325_v5, %v52_v16 }
  0x18   :  { %vm90_vm14 = vcmp.gt.f32.partialorder %v74_v17, 0.0  ;;  %v106_v22 = vmul.f32 0.2, %v74_v17  ;;  %286 = vst [vmem:[%s426_s3 + $0x28] sm:$0xff] %v270_v18   ;;  %v275_v23 = vpack.c.bf16 %v121_v20, %v120_v19 }
  0x19   :  { %vm91_vm15 = vcmp.gt.f32.partialorder %v75_v21, 0.0  ;;  %v107_v2 = vmul.f32 0.2, %v75_v21 }
  0x1a   :  { %v122_v24 = vsel %vm90_vm14, %v74_v17, %v106_v22  ;;  %287 = vst [vmem:[%s426_s3 + $0x30] sm:$0xff] %v275_v23  }
  0x1b   :  { %v123_v25 = vsel %vm91_vm15, %v75_v21, %v107_v2 }
  0x1c   :  { %v280_v26 = vpack.c.bf16 %v123_v25, %v122_v24 }
  0x1e   :  { %288 = vst [vmem:[%s426_s3 + $0x38] sm:$0xff] %v280_v26  }

// kernel: _lambda_.11
= control target key start
LH: loop header
LB: loop body
LE: loop exit
PB: predicated region body
PF: predicated region fallthrough
CT: control target
= control target key end

     0   :  { %vm246_vm0 = vcmask 1040384   ;;  %s438_s1 = inlined_call_operand.vmem [shape: bf16[256,128], index: 1, kind: input, shape index: {}]   ;;  %s439_s0 = inlined_call_operand.vmem [shape: bf16[32,256], index: 0, kind: input, shape index: {}]   ;;  %s440_s2 = inlined_call_operand.vmem [shape: f32[32,128], index: 2, kind: output, shape index: {0}]   ;;  %s441_s3 = inlined_call_operand.vmem [shape: f32[1,2,128], index: 3, kind: output, shape index: {1}]  }
   0x1   :  { %v321_v0 = vld [vmem:[%s438_s1 + $0x40] sm:$0xff]   ;;  %v323_v2 = vld [vmem:[%s438_s1 + $0x48] sm:$0xff]   ;;  %v325_v4 = vld [vmem:[%s438_s1 + $0x50] sm:$0xff]  }
   0x2   :  { %v322_v1 = vld [vmem:[%s438_s1] sm:$0xff]   ;;  %277 = vmatprep.subr.bf16.mxu0 %v321_v0  ;;  %305 = vmatprep.subr.bf16.mxu1 %v321_v0  ;;  %v324_v3 = vld [vmem:[%s438_s1 + $0x8] sm:$0xff]   ;;  %v326_v5 = vld [vmem:[%s438_s1 + $0x10] sm:$0xff]  }
   0x3   :  { %278 = vmatpush3.bf16.msra.mxu0 %v322_v1  ;;  %313 = vmatpush3.bf16.msra.mxu1 %v322_v1  ;;  %v327_v6 = vld [vmem:[%s438_s1 + $0x58] sm:$0xff]   ;;  %v329_v8 = vld [vmem:[%s438_s1 + $0x60] sm:$0xff]   ;;  %v331_v10 = vld [vmem:[%s438_s1 + $0x68] sm:$0xff]  }
   0x4   :  { %279 = vmatprep.subr.bf16.mxu0 %v323_v2  ;;  %306 = vmatprep.subr.bf16.mxu1 %v323_v2  ;;  %v328_v7 = vld [vmem:[%s438_s1 + $0x18] sm:$0xff]   ;;  %v330_v9 = vld [vmem:[%s438_s1 + $0x20] sm:$0xff]   ;;  %v332_v13 = vld [vmem:[%s438_s1 + $0x28] sm:$0xff]  }
   0x5   :  { %v339_v11 = vld [vmem:[%s439_s0 + $0x4] ss:$8 sps:$4 sm:$0xff]   ;;  %v342_v12 = vld [vmem:[%s439_s0 + $0x14] ss:$8 sps:$4 sm:$0xff]   ;;  %v337_v18 = vld [vmem:[%s439_s0] ss:$8 sps:$4 sm:$0xff]  }
   0x6   :  { %v333_v14 = vld [vmem:[%s438_s1 + $0x70] sm:$0xff]   ;;  %198 = vmatprep.mubr.bf16.mxu0 %v339_v11  ;;  %206 = vmatprep.mubr.bf16.mxu1 %v342_v12  ;;  %v335_v16 = vld [vmem:[%s438_s1 + $0x78] sm:$0xff]  }
   0x7   :  { %280 = vmatpush3.bf16.msra.mxu0 %v324_v3  ;;  %314 = vmatpush3.bf16.msra.mxu1 %v324_v3  ;;  %v334_v15 = vld [vmem:[%s438_s1 + $0x30] sm:$0xff]   ;;  %v336_v17 = vld [vmem:[%s438_s1 + $0x38] sm:$0xff]  }
   0x8   :  { %281 = vmatprep.subr.bf16.mxu0 %v325_v4  ;;  %307 = vmatprep.subr.bf16.mxu1 %v325_v4  ;;  %v340_v19 = vld [vmem:[%s439_s0 + $0x10] ss:$8 sps:$4 sm:$0xff]  }
   0xb   :  { %282 = vmatpush3.bf16.msra.mxu0 %v326_v5  ;;  %315 = vmatpush3.bf16.msra.mxu1 %v326_v5 }
   0xc   :  { %283 = vmatprep.subr.bf16.mxu0 %v327_v6  ;;  %308 = vmatprep.subr.bf16.mxu1 %v327_v6 }
   0xf   :  { %284 = vmatpush3.bf16.msra.mxu0 %v328_v7  ;;  %316 = vmatpush3.bf16.msra.mxu1 %v328_v7 }
  0x10   :  { %285 = vmatprep.subr.bf16.mxu0 %v329_v8  ;;  %309 = vmatprep.subr.bf16.mxu1 %v329_v8 }
  0x13   :  { %286 = vmatpush3.bf16.msra.mxu0 %v330_v9  ;;  %317 = vmatpush3.bf16.msra.mxu1 %v330_v9 }
  0x14   :  { %287 = vmatprep.subr.bf16.mxu0 %v331_v10  ;;  %310 = vmatprep.subr.bf16.mxu1 %v331_v10 }
  0x17   :  { %288 = vmatpush3.bf16.msra.mxu0 %v332_v13  ;;  %318 = vmatpush3.bf16.msra.mxu1 %v332_v13 }
  0x18   :  { %289 = vmatprep.subr.bf16.mxu0 %v333_v14  ;;  %311 = vmatprep.subr.bf16.mxu1 %v333_v14 }
  0x1b   :  { %290 = vmatpush3.bf16.msra.mxu0 %v334_v15  ;;  %319 = vmatpush3.bf16.msra.mxu1 %v334_v15 }
  0x1c   :  { %291 = vmatprep.subr.bf16.mxu0 %v335_v16  ;;  %312 = vmatprep.subr.bf16.mxu1 %v335_v16 }
  0x1f   :  { %292 = vmatpush3.bf16.msra.mxu0 %v336_v17  ;;  %320 = vmatpush3.bf16.msra.mxu1 %v336_v17 }
  0x22   :  { %199 = vmatmul.mubr.bf16.vlgmr.msra.gmra.mrb[0].mxu0 %v337_v18  ;;  %207 = vmatmul.mubr.bf16.vlgmr.msra.gmra.mrb[0].mxu1 %v340_v19 }
  0xf5   :  { %v293_v20 = vpop.f32.mrb[0].mxu0  ;;  %v299_v21 = vpop.f32.mrb[0].mxu1 }
  0xf6   :  { %v294_v22 = vpop.f32.mrb[1].mxu0  ;;  %v300_v23 = vpop.f32.mrb[1].mxu1 }
  0xf7   :  { %v295_v24 = vadd.f32 %v294_v22, %v293_v20  ;;  %v296_v25 = vpop.f32.mrb[2].mxu0  ;;  %v301_v26 = vadd.f32 %v300_v23, %v299_v21  ;;  %v302_v27 = vpop.f32.mrb[2].mxu1 }
  0xf8   :  { %v297_v28 = vpop.f32.mrb[3].mxu0  ;;  %v303_v29 = vpop.f32.mrb[3].mxu1 }
  0xf9   :  { %215 = vst [vmem:[%s440_s2] sm:$0xff] %v295_v24  ;;  %217 = vst [vmem:[%s440_s2 + $0x10] sm:$0xff] %v301_v26  ;;  %v298_v30 = vadd.f32 %v297_v28, %v296_v25  ;;  %v304_v31 = vadd.f32 %v303_v29, %v302_v27 }
  0xfb   :  { %216 = vst [vmem:[%s440_s2 + $0x8] sm:$0xff] %v298_v30  ;;  %v219_v32 = vadd.f32 %v298_v30, %v295_v24  ;;  %218 = vst [vmem:[%s440_s2 + $0x18] sm:$0xff] %v304_v31 }
  0xfd   :  { %v220_v33 = vadd.f32 %v301_v26, %v219_v32 }
  0xff   :  { %v221_v34 = vadd.f32 %v304_v31, %v220_v33 }
 0x101   :  { %v222_v35 = vrot.slane %v221_v34, 4 }
 0x103   :  { %v223_v36 = vadd.f32 %v222_v35, %v221_v34 }
 0x105   :  { %v224_v37 = vrot.slane %v223_v36, 2 }
 0x107   :  { %v225_v38 = vadd.f32 %v224_v37, %v223_v36 }
 0x109   :  { %v226_v39 = vrot.slane %v225_v38, 1 }
 0x10b   :  { %v227_v40 = vadd.f32 %v226_v39, %v225_v38 }
 0x10d   :  { %v228_v41 = vmul.f32 0.03125, %v227_v40 }
 0x10f   :  { %v229_v42 = vsub.f32 %v295_v24, %v228_v41  ;;  %v230_v43 = vsub.f32 %v298_v30, %v228_v41  ;;  %v231_v44 = vsub.f32 %v301_v26, %v228_v41  ;;  %v232_v45 = vsub.f32 %v304_v31, %v228_v41 }
 0x111   :  { %v233_v46 = vmul.f32 %v229_v42, %v229_v42  ;;  %v234_v47 = vmul.f32 %v230_v43, %v230_v43  ;;  %v235_v48 = vmul.f32 %v231_v44, %v231_v44  ;;  %v236_v50 = vmul.f32 %v232_v45, %v232_v45 }
 0x113   :  { %v237_v49 = vadd.f32 %v234_v47, %v233_v46 }
 0x115   :  { %v238_v51 = vadd.f32 %v237_v49, %v235_v48 }
 0x117   :  { %v239_v52 = vadd.f32 %v238_v51, %v236_v50 }
 0x119   :  { %v240_v53 = vrot.slane %v239_v52, 4 }
 0x11b   :  { %v241_v54 = vadd.f32 %v240_v53, %v239_v52 }
 0x11d   :  { %v242_v55 = vrot.slane %v241_v54, 2 }
 0x11f   :  { %v243_v56 = vadd.f32 %v242_v55, %v241_v54 }
 0x121   :  { %v244_v57 = vrot.slane %v243_v56, 1 }
 0x123   :  { %v245_v58 = vadd.f32 %v244_v57, %v243_v56 }
 0x125   :  { %v247_v59 = vsel %vm246_vm0, %v227_v40, %v245_v58 }
 0x126   :  { %248 = vst [vmem:[%s441_s3] sm:$0x3] %v247_v59 }

// kernel: _lambda_.12
= control target key start
LH: loop header
LB: loop body
LE: loop exit
PB: predicated region body
PF: predicated region fallthrough
CT: control target
= control target key end

     0   :  { %s141_s0 = inlined_call_operand.vmem [shape: f32[32,128], index: 0, kind: input, shape index: {}]   ;;  %s142_s1 = inlined_call_operand.vmem [shape: f32[1,128], index: 1, kind: input, shape index: {}]   ;;  %s143_s2 = inlined_call_operand.vmem [shape: f32[1,128], index: 2, kind: input, shape index: {}]   ;;  %s144_s3 = inlined_call_operand.vmem [shape: bf16[32,128], index: 3, kind: output, shape index: {}]  }
   0x1   :  { %v14_v0 = vld [vmem:[%s141_s0] sm:$0xff]  ;;  %v15_v1 = vld [vmem:[%s141_s0 + $0x8] sm:$0xff]  ;;  %v16_v6 = vld [vmem:[%s141_s0 + $0x10] sm:$0xff] }
   0x2   :  { %v76_v2 = vld [vmem:[%s142_s1] ss:$0 sm:$0xff]  ;;  %v17_v7 = vld [vmem:[%s141_s0 + $0x18] sm:$0xff] }
   0x3   :  { %v25_v3 = vmul.f32 %v76_v2, %v14_v0  ;;  %v26_v4 = vmul.f32 %v76_v2, %v15_v1  ;;  %v77_v5 = vld [vmem:[%s143_s2] ss:$0 sm:$0xff]  ;;  %v27_v8 = vmul.f32 %v76_v2, %v16_v6  ;;  %v28_v9 = vmul.f32 %v76_v2, %v17_v7 }
   0x5   :  { %v36_v10 = vadd.f32 %v77_v5, %v25_v3  ;;  %v37_v11 = vadd.f32 %v77_v5, %v26_v4  ;;  %v38_v12 = vadd.f32 %v77_v5, %v27_v8  ;;  %v39_v13 = vadd.f32 %v77_v5, %v28_v9 }
   0x7   :  { %vm40_vm0 = vcmp.gt.f32.partialorder %v36_v10, 0.0  ;;  %vm41_vm1 = vcmp.gt.f32.partialorder %v37_v11, 0.0  ;;  %v44_v14 = vmul.f32 0.2, %v36_v10  ;;  %v45_v15 = vmul.f32 0.2, %v37_v11 }
   0x8   :  { %vm42_vm2 = vcmp.gt.f32.partialorder %v38_v12, 0.0  ;;  %vm43_vm3 = vcmp.gt.f32.partialorder %v39_v13, 0.0  ;;  %v46_v16 = vmul.f32 0.2, %v38_v12  ;;  %v47_v17 = vmul.f32 0.2, %v39_v13 }
   0x9   :  { %v48_v18 = vsel %vm40_vm0, %v36_v10, %v44_v14  ;;  %v49_v19 = vsel %vm41_vm1, %v37_v11, %v45_v15 }
   0xa   :  { %v89_v20 = vpack.c.bf16 %v49_v19, %v48_v18  ;;  %v50_v21 = vsel %vm42_vm2, %v38_v12, %v46_v16  ;;  %v51_v22 = vsel %vm43_vm3, %v39_v13, %v47_v17 }
   0xb   :  { %v94_v23 = vpack.c.bf16 %v51_v22, %v50_v21 }
   0xc   :  { %90 = vst [vmem:[%s144_s3] sm:$0xff] %v89_v20  }
   0xd   :  { %96 = vst [vmem:[%s144_s3 + $0x8] sm:$0xff] %v94_v23  }

// kernel: _lambda_.13
= control target key start
LH: loop header
LB: loop body
LE: loop exit
PB: predicated region body
PF: predicated region fallthrough
CT: control target
= control target key end

     0   :  { %v421_v41 = vlaneseq  ;;  %vm476_vm1 = vcmask 1040384   ;;  %s784_s1 = inlined_call_operand.vmem [shape: bf16[512,128], index: 1, kind: input, shape index: {}]   ;;  %s785_s0 = inlined_call_operand.vmem [shape: bf16[32,512], index: 0, kind: input, shape index: {}]   ;;  %s786_s2 = inlined_call_operand.vmem [shape: f32[32,128], index: 2, kind: output, shape index: {0}]   ;;  %s787_s3 = inlined_call_operand.vmem [shape: f32[1,2,128], index: 3, kind: output, shape index: {1}]  }
   0x1   :  { %v583_v0 = vld [vmem:[%s784_s1 + $0x40] sm:$0xff]   ;;  %v587_v4 = vld [vmem:[%s784_s1 + $0x48] sm:$0xff]   ;;  %v591_v8 = vld [vmem:[%s784_s1 + $0x50] sm:$0xff]  }
   0x2   :  { %v584_v1 = vld [vmem:[%s784_s1 + $0xc0] sm:$0xff]   ;;  %527 = vmatprep.subr.bf16.mxu0 %v583_v0  ;;  %v588_v5 = vld [vmem:[%s784_s1 + $0xc8] sm:$0xff]   ;;  %v592_v9 = vld [vmem:[%s784_s1 + $0xd0] sm:$0xff]   ;;  %v422_v52 = vshrl.u32 %v421_v41, 7 }
   0x3   :  { %v585_v2 = vld [vmem:[%s784_s1] sm:$0xff]   ;;  %555 = vmatprep.subr.bf16.mxu1 %v584_v1  ;;  %v589_v6 = vld [vmem:[%s784_s1 + $0x8] sm:$0xff]   ;;  %v593_v10 = vld [vmem:[%s784_s1 + $0x10] sm:$0xff]  }
   0x4   :  { %v586_v3 = vld [vmem:[%s784_s1 + $0x80] sm:$0xff]   ;;  %528 = vmatpush3.bf16.msra.mxu0 %v585_v2  ;;  %v590_v7 = vld [vmem:[%s784_s1 + $0x88] sm:$0xff]   ;;  %v594_v11 = vld [vmem:[%s784_s1 + $0x90] sm:$0xff]   ;;  %v424_v57 = vadd.s32 16, %v422_v52 }
   0x5   :  { %556 = vmatpush3.bf16.msra.mxu1 %v586_v3  ;;  %529 = vmatprep.subr.bf16.mxu0 %v587_v4  ;;  %v595_v12 = vld [vmem:[%s784_s1 + $0x58] sm:$0xff]   ;;  %v599_v16 = vld [vmem:[%s784_s1 + $0x60] sm:$0xff]   ;;  %v603_v20 = vld [vmem:[%s784_s1 + $0x68] sm:$0xff]  }
   0x6   :  { %557 = vmatprep.subr.bf16.mxu1 %v588_v5  ;;  %v596_v13 = vld [vmem:[%s784_s1 + $0xd8] sm:$0xff]   ;;  %v600_v17 = vld [vmem:[%s784_s1 + $0xe0] sm:$0xff]   ;;  %v604_v21 = vld [vmem:[%s784_s1 + $0xe8] sm:$0xff]   ;;  %vm433_vm0 = vcmp.lt.s32.totalorder %v424_v57, 18 }
   0x7   :  { %v597_v14 = vld [vmem:[%s784_s1 + $0x18] sm:$0xff]   ;;  %v601_v18 = vld [vmem:[%s784_s1 + $0x20] sm:$0xff]   ;;  %v605_v22 = vld [vmem:[%s784_s1 + $0x28] sm:$0xff]  }
   0x8   :  { %530 = vmatpush3.bf16.msra.mxu0 %v589_v6  ;;  %v598_v15 = vld [vmem:[%s784_s1 + $0x98] sm:$0xff]   ;;  %v602_v19 = vld [vmem:[%s784_s1 + $0xa0] sm:$0xff]   ;;  %v606_v23 = vld [vmem:[%s784_s1 + $0xa8] sm:$0xff]  }
   0x9   :  { %558 = vmatpush3.bf16.msra.mxu1 %v590_v7  ;;  %531 = vmatprep.subr.bf16.mxu0 %v591_v8  ;;  %v607_v24 = vld [vmem:[%s784_s1 + $0x70] sm:$0xff]   ;;  %v611_v28 = vld [vmem:[%s784_s1 + $0x78] sm:$0xff]  }
   0xa   :  { %559 = vmatprep.subr.bf16.mxu1 %v592_v9  ;;  %v608_v25 = vld [vmem:[%s784_s1 + $0xf0] sm:$0xff]   ;;  %v612_v29 = vld [vmem:[%s784_s1 + $0xf8] sm:$0xff]  }
   0xb   :  { %v609_v26 = vld [vmem:[%s784_s1 + $0x30] sm:$0xff]   ;;  %v613_v30 = vld [vmem:[%s784_s1 + $0x38] sm:$0xff]  }
   0xc   :  { %532 = vmatpush3.bf16.msra.mxu0 %v593_v10  ;;  %v610_v27 = vld [vmem:[%s784_s1 + $0xb0] sm:$0xff]   ;;  %v614_v31 = vld [vmem:[%s784_s1 + $0xb8] sm:$0xff]  }
   0xd   :  { %560 = vmatpush3.bf16.msra.mxu1 %v594_v11  ;;  %533 = vmatprep.subr.bf16.mxu0 %v595_v12  ;;  %v615_v32 = vld [vmem:[%s785_s0] ss:$16 sps:$4 sm:$0xff]   ;;  %v617_v33 = vld [vmem:[%s785_s0 + $0x4] ss:$16 sps:$4 sm:$0xff]   ;;  %v618_v34 = vld [vmem:[%s785_s0 + $0x8] ss:$16 sps:$4 sm:$0xff]  }
   0xe   :  { %561 = vmatprep.subr.bf16.mxu1 %v596_v13  ;;  %v620_v35 = vld [vmem:[%s785_s0 + $0xc] ss:$16 sps:$4 sm:$0xff]   ;;  %350 = vmatprep.mubr.bf16.mxu0 %v617_v33  ;;  %v621_v36 = vld [vmem:[%s785_s0 + $0x24] ss:$16 sps:$4 sm:$0xff]   ;;  %v625_v38 = vld [vmem:[%s785_s0 + $0x20] ss:$16 sps:$4 sm:$0xff]  }
   0xf   :  { %399 = vmatprep.mubr.bf16.mxu1 %v620_v35  ;;  %v623_v37 = vld [vmem:[%s785_s0 + $0x2c] ss:$16 sps:$4 sm:$0xff]   ;;  %v626_v39 = vld [vmem:[%s785_s0 + $0x28] ss:$16 sps:$4 sm:$0xff]  }
  0x10   :  { %534 = vmatpush3.bf16.msra.mxu0 %v597_v14 }
  0x11   :  { %562 = vmatpush3.bf16.msra.mxu1 %v598_v15  ;;  %535 = vmatprep.subr.bf16.mxu0 %v599_v16 }
  0x12   :  { %563 = vmatprep.subr.bf16.mxu1 %v600_v17 }
  0x14   :  { %536 = vmatpush3.bf16.msra.mxu0 %v601_v18 }
  0x15   :  { %564 = vmatpush3.bf16.msra.mxu1 %v602_v19  ;;  %537 = vmatprep.subr.bf16.mxu0 %v603_v20 }
  0x16   :  { %565 = vmatprep.subr.bf16.mxu1 %v604_v21 }
  0x18   :  { %538 = vmatpush3.bf16.msra.mxu0 %v605_v22 }
  0x19   :  { %566 = vmatpush3.bf16.msra.mxu1 %v606_v23  ;;  %539 = vmatprep.subr.bf16.mxu0 %v607_v24 }
  0x1a   :  { %567 = vmatprep.subr.bf16.mxu1 %v608_v25 }
  0x1c   :  { %540 = vmatpush3.bf16.msra.mxu0 %v609_v26 }
  0x1d   :  { %568 = vmatpush3.bf16.msra.mxu1 %v610_v27  ;;  %541 = vmatprep.subr.bf16.mxu0 %v611_v28 }
  0x1e   :  { %569 = vmatprep.subr.bf16.mxu1 %v612_v29 }
  0x20   :  { %542 = vmatpush3.bf16.msra.mxu0 %v613_v30 }
  0x21   :  { %570 = vmatpush3.bf16.msra.mxu1 %v614_v31 }
  0x23   :  { %351 = vmatmul.mubr.bf16.vlgmr.msra.gmra.mrb[0].mxu0 %v615_v32 }
  0x24   :  { %400 = vmatmul.mubr.bf16.vlgmr.msra.gmra.mrb[0].mxu1 %v618_v34  ;;  %358 = vmatprep.mubr.bf16.mxu0 %v621_v36 }
  0x25   :  { %407 = vmatprep.mubr.bf16.mxu1 %v623_v37 }
  0x2b   :  { %359 = vmatmul.mubr.bf16.gmra.mrb[4].mxu0 %v625_v38 }
  0x2c   :  { %408 = vmatmul.mubr.bf16.gmra.mrb[4].mxu1 %v626_v39 }
  0xf6   :  { %v543_v40 = vpop.f32.mrb[0].mxu0 }
  0xf7   :  { %v571_v42 = vpop.f32.mrb[0].mxu1  ;;  %v544_v43 = vpop.f32.mrb[1].mxu0 }
  0xf8   :  { %v545_v44 = vadd.f32 %v544_v43, %v543_v40  ;;  %v572_v45 = vpop.f32.mrb[1].mxu1  ;;  %v546_v46 = vpop.f32.mrb[2].mxu0 }
  0xf9   :  { %v573_v47 = vadd.f32 %v572_v45, %v571_v42  ;;  %v574_v48 = vpop.f32.mrb[2].mxu1  ;;  %v547_v49 = vpop.f32.mrb[3].mxu0 }
  0xfa   :  { %v548_v50 = vadd.f32 %v547_v49, %v546_v46  ;;  %v575_v51 = vpop.f32.mrb[3].mxu1 }
  0xfb   :  { %v402_v53 = vadd.f32 %v573_v47, %v545_v44  ;;  %v576_v54 = vadd.f32 %v575_v51, %v574_v48 }
  0xfd   :  { %416 = vst [vmem:[%s786_s2] sm:$0xff] %v402_v53  ;;  %v405_v55 = vadd.f32 %v576_v54, %v548_v50 }
  0xfe   :  { %v549_v56 = vpop.f32.mrb[4].mxu0 }
  0xff   :  { %417 = vst [vmem:[%s786_s2 + $0x8] sm:$0xff] %v405_v55  ;;  %v443_v58 = vadd.f32 %v405_v55, %v402_v53  ;;  %v577_v59 = vpop.f32.mrb[4].mxu1  ;;  %v550_v60 = vpop.f32.mrb[5].mxu0 }
 0x100   :  { %v551_v61 = vadd.f32 %v550_v60, %v549_v56  ;;  %v578_v62 = vpop.f32.mrb[5].mxu1  ;;  %v552_v63 = vpop.f32.mrb[6].mxu0 }
 0x101   :  { %v579_v0 = vadd.f32 %v578_v62, %v577_v59  ;;  %v580_v1 = vpop.f32.mrb[6].mxu1  ;;  %v553_v2 = vpop.f32.mrb[7].mxu0 }
 0x102   :  { %v554_v3 = vadd.f32 %v553_v2, %v552_v63  ;;  %v581_v4 = vpop.f32.mrb[7].mxu1 }
 0x103   :  { %v410_v5 = vadd.f32 %v579_v0, %v551_v61  ;;  %v582_v6 = vadd.f32 %v581_v4, %v580_v1 }
 0x105   :  { %418 = vst [vmem:[%s786_s2 + $0x10] sm:$0xff] %v410_v5  ;;  %v437_v7 = vsel %vm433_vm0, %v410_v5, 0.0  ;;  %v413_v8 = vadd.f32 %v582_v6, %v554_v3 }
 0x106   :  { %v444_v9 = vadd.f32 %v443_v58, %v437_v7 }
 0x107   :  { %419 = vst [vmem:[%s786_s2 + $0x18] sm:$0xff] %v413_v8 }
 0x108   :  { %v446_v10 = vrot.slane %v444_v9, 4 }
 0x10a   :  { %v447_v11 = vadd.f32 %v446_v10, %v444_v9 }
 0x10c   :  { %v448_v12 = vrot.slane %v447_v11, 2 }
 0x10e   :  { %v449_v13 = vadd.f32 %v448_v12, %v447_v11 }
 0x110   :  { %v450_v14 = vrot.slane %v449_v13, 1 }
 0x112   :  { %v451_v15 = vadd.f32 %v450_v14, %v449_v13 }
 0x114   :  { %v454_v16 = vmul.f32 0.055555556, %v451_v15 }
 0x116   :  { %v455_v17 = vsub.f32 %v402_v53, %v454_v16  ;;  %v456_v18 = vsub.f32 %v405_v55, %v454_v16  ;;  %v457_v19 = vsub.f32 %v410_v5, %v454_v16 }
 0x118   :  { %v461_v20 = vsel %vm433_vm0, %v457_v19, 0.0  ;;  %v463_v21 = vmul.f32 %v455_v17, %v455_v17  ;;  %v464_v22 = vmul.f32 %v456_v18, %v456_v18 }
 0x119   :  { %v465_v23 = vmul.f32 %v461_v20, %v461_v20 }
 0x11a   :  { %v467_v24 = vadd.f32 %v464_v22, %v463_v21 }
 0x11c   :  { %v468_v25 = vadd.f32 %v467_v24, %v465_v23 }
 0x11e   :  { %v470_v26 = vrot.slane %v468_v25, 4 }
 0x120   :  { %v471_v27 = vadd.f32 %v470_v26, %v468_v25 }
 0x122   :  { %v472_v28 = vrot.slane %v471_v27, 2 }
 0x124   :  { %v473_v29 = vadd.f32 %v472_v28, %v471_v27 }
 0x126   :  { %v474_v30 = vrot.slane %v473_v29, 1 }
 0x128   :  { %v475_v31 = vadd.f32 %v474_v30, %v473_v29 }
 0x12a   :  { %v477_v32 = vsel %vm476_vm1, %v451_v15, %v475_v31 }
 0x12b   :  { %478 = vst [vmem:[%s787_s3] sm:$0x3] %v477_v32 }

// kernel: _lambda_.15
= control target key start
LH: loop header
LB: loop body
LE: loop exit
PB: predicated region body
PF: predicated region fallthrough
CT: control target
= control target key end

     0   :  { %s1222_s1 = inlined_call_operand.vmem [shape: bf16[1024,128], index: 1, kind: input, shape index: {}]   ;;  %s1223_s0 = inlined_call_operand.vmem [shape: bf16[16,1024], index: 0, kind: input, shape index: {}]   ;;  %s1224_s2 = inlined_call_operand.vmem [shape: f32[1,128], index: 2, kind: input, shape index: {}]   ;;  %s1225_s3 = inlined_call_operand.vmem [shape: f32[16,128], index: 3, kind: output, shape index: {}]  }
   0x1   :  { %v913_v0 = vld [vmem:[%s1222_s1 + $0x40] sm:$0xff]   ;;  %v917_v4 = vld [vmem:[%s1222_s1 + $0x48] sm:$0xff]   ;;  %v921_v8 = vld [vmem:[%s1222_s1 + $0x50] sm:$0xff]  }
   0x2   :  { %v914_v1 = vld [vmem:[%s1222_s1 + $0xc0] sm:$0xff]   ;;  %825 = vmatprep.subr.bf16.mxu0 %v913_v0  ;;  %v918_v5 = vld [vmem:[%s1222_s1 + $0xc8] sm:$0xff]   ;;  %v922_v9 = vld [vmem:[%s1222_s1 + $0xd0] sm:$0xff]  }
   0x3   :  { %v915_v2 = vld [vmem:[%s1222_s1] sm:$0xff]   ;;  %847 = vmatprep.subr.bf16.mxu1 %v914_v1  ;;  %v919_v6 = vld [vmem:[%s1222_s1 + $0x8] sm:$0xff]   ;;  %v923_v10 = vld [vmem:[%s1222_s1 + $0x10] sm:$0xff]  }
   0x4   :  { %v916_v3 = vld [vmem:[%s1222_s1 + $0x80] sm:$0xff]   ;;  %826 = vmatpush3.bf16.msra.mxu0 %v915_v2  ;;  %v920_v7 = vld [vmem:[%s1222_s1 + $0x88] sm:$0xff]   ;;  %v924_v11 = vld [vmem:[%s1222_s1 + $0x90] sm:$0xff]  }
   0x5   :  { %848 = vmatpush3.bf16.msra.mxu1 %v916_v3  ;;  %827 = vmatprep.subr.bf16.mxu0 %v917_v4  ;;  %v925_v12 = vld [vmem:[%s1222_s1 + $0x58] sm:$0xff]   ;;  %v929_v16 = vld [vmem:[%s1222_s1 + $0x60] sm:$0xff]   ;;  %v933_v20 = vld [vmem:[%s1222_s1 + $0x68] sm:$0xff]  }
   0x6   :  { %849 = vmatprep.subr.bf16.mxu1 %v918_v5  ;;  %v926_v13 = vld [vmem:[%s1222_s1 + $0xd8] sm:$0xff]   ;;  %v930_v17 = vld [vmem:[%s1222_s1 + $0xe0] sm:$0xff]   ;;  %v934_v21 = vld [vmem:[%s1222_s1 + $0xe8] sm:$0xff]  }
   0x7   :  { %v927_v14 = vld [vmem:[%s1222_s1 + $0x18] sm:$0xff]   ;;  %v931_v18 = vld [vmem:[%s1222_s1 + $0x20] sm:$0xff]   ;;  %v935_v22 = vld [vmem:[%s1222_s1 + $0x28] sm:$0xff]  }
   0x8   :  { %828 = vmatpush3.bf16.msra.mxu0 %v919_v6  ;;  %v928_v15 = vld [vmem:[%s1222_s1 + $0x98] sm:$0xff]   ;;  %v932_v19 = vld [vmem:[%s1222_s1 + $0xa0] sm:$0xff]   ;;  %v936_v23 = vld [vmem:[%s1222_s1 + $0xa8] sm:$0xff]  }
   0x9   :  { %850 = vmatpush3.bf16.msra.mxu1 %v920_v7  ;;  %829 = vmatprep.subr.bf16.mxu0 %v921_v8  ;;  %v937_v24 = vld [vmem:[%s1222_s1 + $0x70] sm:$0xff]   ;;  %v941_v28 = vld [vmem:[%s1222_s1 + $0x78] sm:$0xff]   ;;  %v15_v32 = vld [vmem:[%s1223_s0] sm:$0xff] }
   0xa   :  { %851 = vmatprep.subr.bf16.mxu1 %v922_v9  ;;  %v938_v25 = vld [vmem:[%s1222_s1 + $0xf0] sm:$0xff]   ;;  %v942_v29 = vld [vmem:[%s1222_s1 + $0xf8] sm:$0xff]   ;;  %v19_v33 = vld [vmem:[%s1223_s0 + $0x20] sm:$0xff] }
   0xb   :  { %v939_v26 = vld [vmem:[%s1222_s1 + $0x30] sm:$0xff]   ;;  %v943_v30 = vld [vmem:[%s1222_s1 + $0x38] sm:$0xff]   ;;  %v16_v34 = vld [vmem:[%s1223_s0 + $0x8] sm:$0xff]  ;;  %v753_v35 = vcombine.low %v15_v32, %v19_v33  ;;  %v754_v36 = vcombine.high %v15_v32, %v19_v33 }
   0xc   :  { %830 = vmatpush3.bf16.msra.mxu0 %v923_v10  ;;  %v940_v27 = vld [vmem:[%s1222_s1 + $0xb0] sm:$0xff]   ;;  %v944_v31 = vld [vmem:[%s1222_s1 + $0xb8] sm:$0xff]   ;;  %v20_v37 = vld [vmem:[%s1223_s0 + $0x28] sm:$0xff] }
   0xd   :  { %852 = vmatpush3.bf16.msra.mxu1 %v924_v11  ;;  %831 = vmatprep.subr.bf16.mxu0 %v925_v12  ;;  %v755_v38 = vcombine.low %v16_v34, %v20_v37  ;;  %v756_v39 = vcombine.high %v16_v34, %v20_v37  ;;  %v945_v40 = vld [vmem:[%s1222_s1 + $0x140] sm:$0xff]   ;;  %v949_v44 = vld [vmem:[%s1222_s1 + $0x148] sm:$0xff]   ;;  %v953_v48 = vld [vmem:[%s1222_s1 + $0x150] sm:$0xff]  }
   0xe   :  { %853 = vmatprep.subr.bf16.mxu1 %v926_v13  ;;  %614 = vmatprep.mubr.bf16.mxu0 %v754_v36  ;;  %v946_v41 = vld [vmem:[%s1222_s1 + $0x1c0] sm:$0xff]   ;;  %v950_v45 = vld [vmem:[%s1222_s1 + $0x1c8] sm:$0xff]   ;;  %v954_v49 = vld [vmem:[%s1222_s1 + $0x1d0] sm:$0xff]  }
   0xf   :  { %655 = vmatprep.mubr.bf16.mxu1 %v756_v39  ;;  %v947_v42 = vld [vmem:[%s1222_s1 + $0x100] sm:$0xff]   ;;  %v951_v46 = vld [vmem:[%s1222_s1 + $0x108] sm:$0xff]   ;;  %v955_v50 = vld [vmem:[%s1222_s1 + $0x110] sm:$0xff]  }
  0x10   :  { %832 = vmatpush3.bf16.msra.mxu0 %v927_v14  ;;  %v948_v43 = vld [vmem:[%s1222_s1 + $0x180] sm:$0xff]   ;;  %v952_v47 = vld [vmem:[%s1222_s1 + $0x188] sm:$0xff]   ;;  %v956_v51 = vld [vmem:[%s1222_s1 + $0x190] sm:$0xff]  }
  0x11   :  { %854 = vmatpush3.bf16.msra.mxu1 %v928_v15  ;;  %833 = vmatprep.subr.bf16.mxu0 %v929_v16  ;;  %v957_v52 = vld [vmem:[%s1222_s1 + $0x158] sm:$0xff]   ;;  %v961_v56 = vld [vmem:[%s1222_s1 + $0x160] sm:$0xff]   ;;  %v965_v60 = vld [vmem:[%s1222_s1 + $0x168] sm:$0xff]  }
  0x12   :  { %855 = vmatprep.subr.bf16.mxu1 %v930_v17  ;;  %v958_v53 = vld [vmem:[%s1222_s1 + $0x1d8] sm:$0xff]   ;;  %v962_v57 = vld [vmem:[%s1222_s1 + $0x1e0] sm:$0xff]   ;;  %v966_v61 = vld [vmem:[%s1222_s1 + $0x1e8] sm:$0xff]  }
  0x13   :  { %v959_v54 = vld [vmem:[%s1222_s1 + $0x118] sm:$0xff]   ;;  %v963_v58 = vld [vmem:[%s1222_s1 + $0x120] sm:$0xff]   ;;  %v967_v62 = vld [vmem:[%s1222_s1 + $0x128] sm:$0xff]  }
  0x14   :  { %834 = vmatpush3.bf16.msra.mxu0 %v931_v18  ;;  %v960_v55 = vld [vmem:[%s1222_s1 + $0x198] sm:$0xff]   ;;  %v964_v59 = vld [vmem:[%s1222_s1 + $0x1a0] sm:$0xff]   ;;  %v968_v63 = vld [vmem:[%s1222_s1 + $0x1a8] sm:$0xff]  }
  0x15   :  { %856 = vmatpush3.bf16.msra.mxu1 %v932_v19  ;;  %835 = vmatprep.subr.bf16.mxu0 %v933_v20  ;;  %v969_v0 = vld [vmem:[%s1222_s1 + $0x170] sm:$0xff]   ;;  %v973_v4 = vld [vmem:[%s1222_s1 + $0x178] sm:$0xff]   ;;  %v752_v18 = vld [vmem:[%s1224_s2] ss:$0 sm:$0xff] }
  0x16   :  { %857 = vmatprep.subr.bf16.mxu1 %v934_v21  ;;  %v970_v1 = vld [vmem:[%s1222_s1 + $0x1f0] sm:$0xff]   ;;  %v974_v5 = vld [vmem:[%s1222_s1 + $0x1f8] sm:$0xff]  }
  0x17   :  { %v971_v2 = vld [vmem:[%s1222_s1 + $0x130] sm:$0xff]   ;;  %v975_v6 = vld [vmem:[%s1222_s1 + $0x138] sm:$0xff]  }
  0x18   :  { %836 = vmatpush3.bf16.msra.mxu0 %v935_v22  ;;  %v972_v3 = vld [vmem:[%s1222_s1 + $0x1b0] sm:$0xff]   ;;  %v976_v7 = vld [vmem:[%s1222_s1 + $0x1b8] sm:$0xff]  }
  0x19   :  { %858 = vmatpush3.bf16.msra.mxu1 %v936_v23  ;;  %837 = vmatprep.subr.bf16.mxu0 %v937_v24  ;;  %v17_v8 = vld [vmem:[%s1223_s0 + $0x10] sm:$0xff]  ;;  %v18_v12 = vld [vmem:[%s1223_s0 + $0x18] sm:$0xff] }
  0x1a   :  { %859 = vmatprep.subr.bf16.mxu1 %v938_v25  ;;  %v21_v9 = vld [vmem:[%s1223_s0 + $0x30] sm:$0xff]  ;;  %v22_v13 = vld [vmem:[%s1223_s0 + $0x38] sm:$0xff] }
  0x1b   :  { %v757_v10 = vcombine.low %v17_v8, %v21_v9  ;;  %v758_v11 = vcombine.high %v17_v8, %v21_v9  ;;  %v759_v14 = vcombine.low %v18_v12, %v22_v13  ;;  %v760_v15 = vcombine.high %v18_v12, %v22_v13 }
  0x1c   :  { %838 = vmatpush3.bf16.msra.mxu0 %v939_v26 }
  0x1d   :  { %860 = vmatpush3.bf16.msra.mxu1 %v940_v27  ;;  %839 = vmatprep.subr.bf16.mxu0 %v941_v28 }
  0x1e   :  { %861 = vmatprep.subr.bf16.mxu1 %v942_v29 }
  0x20   :  { %840 = vmatpush3.bf16.msra.mxu0 %v943_v30 }
  0x21   :  { %862 = vmatpush3.bf16.msra.mxu1 %v944_v31  ;;  %869 = vmatprep.subr.bf16.mxu0 %v945_v40 }
  0x22   :  { %891 = vmatprep.subr.bf16.mxu1 %v946_v41 }
  0x23   :  { %615 = vmatmul.mubr.bf16.vlgmr.msra.gmra.mrb[0].mxu0 %v753_v35 }
  0x24   :  { %656 = vmatmul.mubr.bf16.vlgmr.msra.gmra.mrb[0].mxu1 %v755_v38  ;;  %870 = vmatpush3.bf16.msra.mxu0 %v947_v42 }
  0x25   :  { %892 = vmatpush3.bf16.msra.mxu1 %v948_v43  ;;  %871 = vmatprep.subr.bf16.mxu0 %v949_v44 }
  0x26   :  { %893 = vmatprep.subr.bf16.mxu1 %v950_v45  ;;  %696 = vmatprep.mubr.bf16.mxu0 %v758_v11 }
  0x27   :  { %737 = vmatprep.mubr.bf16.mxu1 %v760_v15 }
  0x28   :  { %872 = vmatpush3.bf16.msra.mxu0 %v951_v46 }
  0x29   :  { %894 = vmatpush3.bf16.msra.mxu1 %v952_v47  ;;  %873 = vmatprep.subr.bf16.mxu0 %v953_v48 }
  0x2a   :  { %895 = vmatprep.subr.bf16.mxu1 %v954_v49 }
  0x2c   :  { %874 = vmatpush3.bf16.msra.mxu0 %v955_v50 }
  0x2d   :  { %896 = vmatpush3.bf16.msra.mxu1 %v956_v51  ;;  %875 = vmatprep.subr.bf16.mxu0 %v957_v52 }
  0x2e   :  { %897 = vmatprep.subr.bf16.mxu1 %v958_v53 }
  0x30   :  { %876 = vmatpush3.bf16.msra.mxu0 %v959_v54 }
  0x31   :  { %898 = vmatpush3.bf16.msra.mxu1 %v960_v55  ;;  %877 = vmatprep.subr.bf16.mxu0 %v961_v56 }
  0x32   :  { %899 = vmatprep.subr.bf16.mxu1 %v962_v57 }
  0x34   :  { %878 = vmatpush3.bf16.msra.mxu0 %v963_v58 }
  0x35   :  { %900 = vmatpush3.bf16.msra.mxu1 %v964_v59  ;;  %879 = vmatprep.subr.bf16.mxu0 %v965_v60 }
  0x36   :  { %901 = vmatprep.subr.bf16.mxu1 %v966_v61 }
  0x38   :  { %880 = vmatpush3.bf16.msra.mxu0 %v967_v62 }
  0x39   :  { %902 = vmatpush3.bf16.msra.mxu1 %v968_v63  ;;  %881 = vmatprep.subr.bf16.mxu0 %v969_v0 }
  0x3a   :  { %903 = vmatprep.subr.bf16.mxu1 %v970_v1 }
  0x3c   :  { %882 = vmatpush3.bf16.msra.mxu0 %v971_v2 }
  0x3d   :  { %904 = vmatpush3.bf16.msra.mxu1 %v972_v3  ;;  %883 = vmatprep.subr.bf16.mxu0 %v973_v4 }
  0x3e   :  { %905 = vmatprep.subr.bf16.mxu1 %v974_v5 }
  0x40   :  { %884 = vmatpush3.bf16.msra.mxu0 %v975_v6 }
  0x41   :  { %906 = vmatpush3.bf16.msra.mxu1 %v976_v7 }
  0x43   :  { %697 = vmatmul.mubr.bf16.vlgmr.msra.gmra.mrb[4].mxu0 %v757_v10 }
  0x44   :  { %738 = vmatmul.mubr.bf16.vlgmr.msra.gmra.mrb[4].mxu1 %v759_v14 }
  0xf6   :  { %v841_v16 = vpop.f32.mrb[0].mxu0 }
  0xf7   :  { %v863_v17 = vpop.f32.mrb[0].mxu1  ;;  %v842_v19 = vpop.f32.mrb[1].mxu0 }
  0xf8   :  { %v843_v20 = vadd.f32 %v842_v19, %v841_v16  ;;  %v864_v21 = vpop.f32.mrb[1].mxu1  ;;  %v844_v22 = vpop.f32.mrb[2].mxu0 }
  0xf9   :  { %v865_v23 = vadd.f32 %v864_v21, %v863_v17  ;;  %v866_v24 = vpop.f32.mrb[2].mxu1  ;;  %v845_v25 = vpop.f32.mrb[3].mxu0 }
  0xfa   :  { %v617_v26 = vadd.f32 %v843_v20, %v752_v18  ;;  %v846_v27 = vadd.f32 %v845_v25, %v844_v22  ;;  %v867_v28 = vpop.f32.mrb[3].mxu1 }
  0xfb   :  { %v868_v29 = vadd.f32 %v867_v28, %v866_v24 }
  0xfc   :  { %v658_v30 = vadd.f32 %v865_v23, %v617_v26  ;;  %v620_v31 = vadd.f32 %v846_v27, %v752_v18 }
  0xfe   :  { %v661_v32 = vadd.f32 %v868_v29, %v620_v31 }
 0x116   :  { %v885_v33 = vpop.f32.mrb[4].mxu0 }
 0x117   :  { %v907_v34 = vpop.f32.mrb[4].mxu1  ;;  %v886_v35 = vpop.f32.mrb[5].mxu0 }
 0x118   :  { %v887_v36 = vadd.f32 %v886_v35, %v885_v33  ;;  %v908_v37 = vpop.f32.mrb[5].mxu1  ;;  %v888_v38 = vpop.f32.mrb[6].mxu0 }
 0x119   :  { %v909_v39 = vadd.f32 %v908_v37, %v907_v34  ;;  %v910_v40 = vpop.f32.mrb[6].mxu1  ;;  %v889_v41 = vpop.f32.mrb[7].mxu0 }
 0x11a   :  { %v699_v42 = vadd.f32 %v887_v36, %v658_v30  ;;  %v890_v43 = vadd.f32 %v889_v41, %v888_v38  ;;  %v911_v44 = vpop.f32.mrb[7].mxu1 }
 0x11b   :  { %v912_v45 = vadd.f32 %v911_v44, %v910_v40 }
 0x11c   :  { %v740_v46 = vadd.f32 %v909_v39, %v699_v42  ;;  %v702_v47 = vadd.f32 %v890_v43, %v661_v32 }
 0x11e   :  { %746 = vst [vmem:[%s1225_s3] sm:$0xff] %v740_v46  ;;  %v743_v48 = vadd.f32 %v912_v45, %v702_v47 }
 0x120   :  { %747 = vst [vmem:[%s1225_s3 + $0x8] sm:$0xff] %v743_v48 }

</bundles_post_ra>
